<compile_context>
chip_gen: v6e
topology: v6e:2x2x1
jax: 0.10.0
libtpu: 0.0.40
codegen_flags: <defaults>
</compile_context>

<pallas_src>
import jax
import jax.numpy as jnp
import numpy as np
from jax.experimental import pallas as pl
from jax.experimental.pallas import tpu as pltpu


def _round_up(x, m):
    return ((x + m - 1) // m) * m


def _cdiv(a, b):
    return (a + b - 1) // b


def _make_expanders(N, d):
    """Fixed 0/1 matrices turning the batched adjacency aggregation
         agg[b, i*d+f] = sum_j adj[b,i,j] * h[b, j*d+f]
       into  agg = ((adj_flat @ P1) * (h @ P2)) @ R
       using expanded lane index e = (i*N + j)*d + f."""
    E = N * N * d
    p1 = np.zeros((N * N, E), np.float32)
    p2 = np.zeros((N * d, E), np.float32)
    r = np.zeros((E, N * d), np.float32)
    for i in range(N):
        for j in range(N):
            for f in range(d):
                e = (i * N + j) * d + f
                p1[i * N + j, e] = 1.0
                p2[j * d + f, e] = 1.0
                r[e, i * d + f] = 1.0
    return p1, p2, r


# ---------------------------------------------------------------------------
# Kernels
# ---------------------------------------------------------------------------

def _shared_adj_kernel(x_ref, g1_ref, b1_ref, g2_ref, b2_ref, g3_ref, b3_ref,
                       wf_ref, bf_ref, wo_ref, bo_ref, q_ref):
    """Shared (2-D) adjacency: every layer is one fused matmul + bias + ReLU."""
    f32 = jnp.float32
    dt = x_ref.dtype

    def lin_relu(h, w_ref, b_ref):
        z = jnp.dot(h, w_ref[...], preferred_element_type=f32) + b_ref[...]
        return jnp.maximum(z, 0.0).astype(dt)

    h = x_ref[...]                              # (BT, N*Din)
    h = lin_relu(h, g1_ref, b1_ref)             # h @ kron(adj^T, W1^T)
    h = lin_relu(h, g2_ref, b2_ref)             # h @ kron(adj^T, W2^T)
    h = lin_relu(h, g3_ref, b3_ref)             # h @ kron(adj^T, W3^T)
    h = lin_relu(h, wf_ref, bf_ref)             # fc1 -> (BT, 54)
    q = jnp.dot(h, wo_ref[...], preferred_element_type=f32) + bo_ref[...]
    q_ref[...] = q.astype(q_ref.dtype)          # (BT, A_pad)


def _make_batched_kernel(d_layers, d_to_idx, num_d):
    """Per-batch (3-D) adjacency.  a_exp = adj_flat @ P1_d is hoisted per
    distinct feature width d; R is pre-folded into each layer weight (RW)."""

    def kernel(*refs):
        x_ref, adj_ref = refs[0], refs[1]
        p1_refs = refs[2:2 + num_d]
        p2_refs = refs[2 + num_d:2 + 2 * num_d]
        (rw1_ref, b1_ref, rw2_ref, b2_ref, rw3_ref, b3_ref,
         wf_ref, bf_ref, wo_ref, bo_ref) = refs[2 + 2 * num_d:-1]
        q_ref = refs[-1]

        f32 = jnp.float32
        dt = x_ref.dtype
        adjf = adj_ref[...]                               # (BT, N*N)

        # Hoisted adjacency expansion: one matmul per distinct feature width.
        a_exp = [jnp.dot(adjf, p1_refs[k][...],
                         preferred_element_type=f32).astype(dt)
                 for k in range(num_d)]

        def gcn_layer(h, k, rw_ref, b_ref):
            h_exp = jnp.dot(h, p2_refs[k][...],
                            preferred_element_type=f32).astype(dt)
            z = jnp.dot(a_exp[k] * h_exp, rw_ref[...],
                        preferred_element_type=f32) + b_ref[...]
            return jnp.maximum(z, 0.0).astype(dt)

        h = x_ref[...]                                               # (BT, N*Din)
        h = gcn_layer(h, d_to_idx[d_layers[0]], rw1_ref, b1_ref)     # (BT, N*4)
        h = gcn_layer(h, d_to_idx[d_layers[1]], rw2_ref, b2_ref)     # (BT, N*Dout)
        h = gcn_layer(h, d_to_idx[d_layers[2]], rw3_ref, b3_ref)     # (BT, N*3)
        h = jnp.maximum(
            jnp.dot(h, wf_ref[...], preferred_element_type=f32) + bf_ref[...],
            0.0).astype(dt)                                          # fc1 -> (BT, 54)
        q = jnp.dot(h, wo_ref[...], preferred_element_type=f32) + bo_ref[...]
        q_ref[...] = q.astype(q_ref.dtype)                           # (BT, A_pad)

    return kernel


# ---------------------------------------------------------------------------
# Host wrapper
# ---------------------------------------------------------------------------

def sxs_gcn_forward(X, adj, params, *, number_of_node, dim_input,
                    block_batch=1024, compute_dtype=jnp.float32):
    N, Din = number_of_node, dim_input
    assert Din == 3, "sxsGCN.forward only shape-checks when dim_input == 3"
    B = X.shape[0]
    Dout = params['node_update2.weight'].shape[0]
    A = params['out.weight'].shape[0]
    A_pad = _round_up(A, 128)          # full-lane (unmasked) output stores
    dt = compute_dtype
    f32 = jnp.float32

    # Batch tile: multiple of 8 sublanes; capped at ceil(B/2) so the grid has
    # >= 2 "parallel" steps whenever B allows (uses both v7x TensorCores).
    BT = max(8, min(_round_up(block_batch, 8),
                    _round_up(max(_cdiv(B, 2), 1), 8)))
    B_pad = _round_up(B, BT)
    num_tiles = B_pad // BT

    Xf = X.reshape(B, N * Din).astype(dt)
    if B_pad != B:
        Xf = jnp.pad(Xf, ((0, B_pad - B), (0, 0)))

    # f32 master copies of the weights / biases (host-side prep).
    W1 = params['node_update1.weight'].astype(f32)
    W2 = params['node_update2.weight'].astype(f32)
    W3 = params['node_update3.weight'].astype(f32)
    b1 = jnp.tile(params['node_update1.bias'].astype(f32), N)[None, :]   # (1, N*4)
    b2 = jnp.tile(params['node_update2.bias'].astype(f32), N)[None, :]   # (1, N*Dout)
    b3 = jnp.tile(params['node_update3.bias'].astype(f32), N)[None, :]   # (1, N*3)
    wf = params['fc1.weight'].T.astype(dt)                               # (N*3, 54)
    bf = params['fc1.bias'].astype(f32)[None, :]                         # (1, 54)
    wo = jnp.zeros((54, A_pad), f32).at[:, :A].set(
        params['out.weight'].T.astype(f32)).astype(dt)                   # (54, A_pad)
    bo = jnp.zeros((1, A_pad), f32).at[0, :A].set(
        params['out.bias'].astype(f32))                                  # (1, A_pad)

    x_spec = pl.BlockSpec((BT, N * Din), lambda t: (t, 0))
    out_spec = pl.BlockSpec((BT, A_pad), lambda t: (t, 0))

    def const_spec(a):
        return pl.BlockSpec(a.shape, lambda t: (0, 0))

    if adj.ndim == 2:
        # Fast path: fold the shared adjacency into each per-node Linear:
        #   h' = relu(h @ kron(adj^T, W^T) + tile(bias)).
        adjT = adj.astype(f32).T
        g1 = jnp.kron(adjT, W1.T).astype(dt)                 # (N*Din,  N*4)
        g2 = jnp.kron(adjT, W2.T).astype(dt)                 # (N*4,    N*Dout)
        g3 = jnp.kron(adjT, W3.T).astype(dt)                 # (N*Dout, N*3)
        consts = (g1, b1, g2, b2, g3, b3, wf, bf, wo, bo)
        kernel = _shared_adj_kernel
        args = (Xf,) + consts
        in_specs = [x_spec] + [const_spec(c) for c in consts]
    else:
        adjf = adj.reshape(B, N * N).astype(dt)
        if B_pad != B:
            adjf = jnp.pad(adjf, ((0, B_pad - B), (0, 0)))
        adj_spec = pl.BlockSpec((BT, N * N), lambda t: (t, 0))

        d_layers = (Din, 4, Dout)                 # per-layer input feature width
        distinct_d = sorted(set(d_layers))
        d_to_idx = {d: i for i, d in enumerate(distinct_d)}
        expanders = {d: _make_expanders(N, d) for d in distinct_d}
        p1s = tuple(jnp.asarray(expanders[d][0]).astype(dt) for d in distinct_d)
        p2s = tuple(jnp.asarray(expanders[d][1]).astype(dt) for d in distinct_d)
        eye = jnp.eye(N, dtype=f32)
        # Fold the lane-reduction R into each per-node Linear: RW = R @ kron(I, W^T).
        rw1 = (jnp.asarray(expanders[Din][2]) @ jnp.kron(eye, W1.T)).astype(dt)
        rw2 = (jnp.asarray(expanders[4][2]) @ jnp.kron(eye, W2.T)).astype(dt)
        rw3 = (jnp.asarray(expanders[Dout][2]) @ jnp.kron(eye, W3.T)).astype(dt)
        consts = p1s + p2s + (rw1, b1, rw2, b2, rw3, b3, wf, bf, wo, bo)
        kernel = _make_batched_kernel(d_layers, d_to_idx, len(distinct_d))
        args = (Xf, adjf) + consts
        in_specs = [x_spec, adj_spec] + [const_spec(c) for c in consts]

    out = pl.pallas_call(
        kernel,
        out_shape=jax.ShapeDtypeStruct((B_pad, A_pad), jnp.float32),
        grid=(num_tiles,),
        in_specs=in_specs,
        out_specs=out_spec,
        compiler_params=pltpu.CompilerParams(dimension_semantics=("parallel",)),
    )(*args)
    return out[:B, :A]                                        # (B, A)


# ---------------------------------------------------------------------------
# Reference / params
# ---------------------------------------------------------------------------

def init_params(key, number_of_node, dim_input, dim_output, dim_action):
    """Deterministic init mimicking nn.Linear default (uniform +-1/sqrt(fan_in))."""
    def linear(k, out_dim, in_dim):
        kw, kb = jax.random.split(k)
        bound = 1.0 / np.sqrt(in_dim)
        w = jax.random.uniform(kw, (out_dim, in_dim), jnp.float32, -bound, bound)
        b = jax.random.uniform(kb, (out_dim,), jnp.float32, -bound, bound)
        return w, b

    keys = jax.random.split(key, 5)
    p = {}
    p['node_update1.weight'], p['node_update1.bias'] = linear(keys[0], 4, dim_input)
    p['node_update2.weight'], p['node_update2.bias'] = linear(keys[1], dim_output, 4)
    p['node_update3.weight'], p['node_update3.bias'] = linear(keys[2], 3, dim_output)
    p['fc1.weight'], p['fc1.bias'] = linear(keys[3], 54, number_of_node * dim_input)
    p['out.weight'], p['out.bias'] = linear(keys[4], dim_action, 54)
    return p


def reference_forward(X, adj, params, *, number_of_node, dim_input):
    """Pure-JAX replica of the PyTorch forward for verification."""
    B = X.shape[0]
    h = X.reshape(B, number_of_node, dim_input).astype(jnp.float32)
    if adj.ndim == 2:
        agg = lambda a, x: jnp.einsum('ij,bjd->bid', a, x)
    else:
        agg = lambda a, x: jnp.einsum('bij,bjd->bid', a, x)
    h = jax.nn.relu(agg(adj, h) @ params['node_update1.weight'].T + params['node_update1.bias'])
    h = jax.nn.relu(agg(adj, h) @ params['node_update2.weight'].T + params['node_update2.bias'])
    h = jax.nn.relu(agg(adj, h) @ params['node_update3.weight'].T + params['node_update3.bias'])
    h = h.reshape(B, -1)
    h = jax.nn.relu(h @ params['fc1.weight'].T + params['fc1.bias'])
    return h @ params['out.weight'].T + params['out.bias']


if __name__ == "__main__":
    N = 8            # number_of_node
    Din = 3          # dim_input (must be 3 for the original forward to shape-check)
    Dout = 4         # dim_output
    A = N            # dim_action defaults to number_of_node
    B = 256          # batch
    BT = 128         # batch tile -> grid=(2,), shardable across v7x's 2 TensorCores

    key = jax.random.PRNGKey(0)
    kx, ka, kp = jax.random.split(key, 3)
    X = jax.random.normal(kx, (B, N * Din), dtype=jnp.float32)
    adj_b = jax.random.uniform(ka, (B, N, N), dtype=jnp.float32)
    adj_s = jax.random.uniform(jax.random.fold_in(ka, 1), (N, N), dtype=jnp.float32)
    params = init_params(kp, N, Din, Dout, A)

    # 1) per-batch (3-D) adjacency, f32 compute
    q = jax.block_until_ready(
        sxs_gcn_forward(X, adj_b, params, number_of_node=N, dim_input=Din,
                        block_batch=BT))
    q_ref = reference_forward(X, adj_b, params, number_of_node=N, dim_input=Din)
    np.testing.assert_allclose(np.asarray(q), np.asarray(q_ref), rtol=1e-4, atol=1e-4)

    # 2) shared (2-D) adjacency fast path: one fused kron(adj^T, W^T) matmul/layer
    q2 = jax.block_until_ready(
        sxs_gcn_forward(X, adj_s, params, number_of_node=N, dim_input=Din,
                        block_batch=BT))
    q2_ref = reference_forward(X, adj_s, params, number_of_node=N, dim_input=Din)
    np.testing.assert_allclose(np.asarray(q2), np.asarray(q2_ref), rtol=1e-4, atol=1e-4)

    # 3) optional bf16 MXU compute (f32 accumulation) -> looser tolerance
    q3 = jax.block_until_ready(
        sxs_gcn_forward(X, adj_b, params, number_of_node=N, dim_input=Din,
                        block_batch=BT, compute_dtype=jnp.bfloat16))
    np.testing.assert_allclose(np.asarray(q3), np.asarray(q_ref), rtol=1e-1, atol=1e-1)

    print("KERNEL_OK")
</pallas_src>

<mosaic_0001>
module attributes {stable_mosaic.version = 11 : i64} {
  func.func @kernel(%arg0: i32, %arg1: memref<128x24xf32, #tpu.memory_space<vmem>>, %arg2: memref<128x64xf32, #tpu.memory_space<vmem>>, %arg3: memref<64x192xf32, #tpu.memory_space<vmem>>, %arg4: memref<64x256xf32, #tpu.memory_space<vmem>>, %arg5: memref<24x192xf32, #tpu.memory_space<vmem>>, %arg6: memref<32x256xf32, #tpu.memory_space<vmem>>, %arg7: memref<192x32xf32, #tpu.memory_space<vmem>>, %arg8: memref<1x32xf32, #tpu.memory_space<vmem>>, %arg9: memref<256x32xf32, #tpu.memory_space<vmem>>, %arg10: memref<1x32xf32, #tpu.memory_space<vmem>>, %arg11: memref<256x24xf32, #tpu.memory_space<vmem>>, %arg12: memref<1x24xf32, #tpu.memory_space<vmem>>, %arg13: memref<24x54xf32, #tpu.memory_space<vmem>>, %arg14: memref<1x54xf32, #tpu.memory_space<vmem>>, %arg15: memref<54x128xf32, #tpu.memory_space<vmem>>, %arg16: memref<1x128xf32, #tpu.memory_space<vmem>>, %arg17: memref<128x128xf32, #tpu.memory_space<vmem>>) attributes {dimension_semantics = [#tpu.dimension_semantics<parallel>], iteration_bounds = array<i64: 2>, scalar_prefetch = 0 : i64, scratch_operands = 0 : i64, tpu.core_type = #tpu.core_type<tc>, window_params = [{transform_indices = @transform_0, window_bounds = array<i64: 128, 24>}, {transform_indices = @transform_1, window_bounds = array<i64: 128, 64>}, {pipeline_mode = #tpu.pipeline_mode<synchronous>, transform_indices = @transform_2, window_bounds = array<i64: 64, 192>}, {pipeline_mode = #tpu.pipeline_mode<synchronous>, transform_indices = @transform_3, window_bounds = array<i64: 64, 256>}, {pipeline_mode = #tpu.pipeline_mode<synchronous>, transform_indices = @transform_4, window_bounds = array<i64: 24, 192>}, {pipeline_mode = #tpu.pipeline_mode<synchronous>, transform_indices = @transform_5, window_bounds = array<i64: 32, 256>}, {pipeline_mode = #tpu.pipeline_mode<synchronous>, transform_indices = @transform_6, window_bounds = array<i64: 192, 32>}, {pipeline_mode = #tpu.pipeline_mode<synchronous>, transform_indices = @transform_7, window_bounds = array<i64: 1, 32>}, {pipeline_mode = #tpu.pipeline_mode<synchronous>, transform_indices = @transform_8, window_bounds = array<i64: 256, 32>}, {pipeline_mode = #tpu.pipeline_mode<synchronous>, transform_indices = @transform_9, window_bounds = array<i64: 1, 32>}, {pipeline_mode = #tpu.pipeline_mode<synchronous>, transform_indices = @transform_10, window_bounds = array<i64: 256, 24>}, {pipeline_mode = #tpu.pipeline_mode<synchronous>, transform_indices = @transform_11, window_bounds = array<i64: 1, 24>}, {pipeline_mode = #tpu.pipeline_mode<synchronous>, transform_indices = @transform_12, window_bounds = array<i64: 24, 54>}, {pipeline_mode = #tpu.pipeline_mode<synchronous>, transform_indices = @transform_13, window_bounds = array<i64: 1, 54>}, {pipeline_mode = #tpu.pipeline_mode<synchronous>, transform_indices = @transform_14, window_bounds = array<i64: 54, 128>}, {pipeline_mode = #tpu.pipeline_mode<synchronous>, transform_indices = @transform_15, window_bounds = array<i64: 1, 128>}, {transform_indices = @transform_16, window_bounds = array<i64: 128, 128>}]} {
    %c0 = arith.constant 0 : index
    %c0_0 = arith.constant 0 : index
    %0 = vector.load %arg2[%c0, %c0_0] : memref<128x64xf32, #tpu.memory_space<vmem>>, vector<128x64xf32>
    %c0_1 = arith.constant 0 : index
    %c0_2 = arith.constant 0 : index
    %1 = vector.load %arg3[%c0_1, %c0_2] : memref<64x192xf32, #tpu.memory_space<vmem>>, vector<64x192xf32>
    %cst = arith.constant dense<0.000000e+00> : vector<128x192xf32>
    %2 = tpu.matmul %0, %1, %cst {dimension_numbers = #tpu.dot_dimension_numbers<[1], [0], [0], [1], [0, 0, 1, 1], [], []>} : vector<128x64xf32>, vector<64x192xf32>, vector<128x192xf32> -> vector<128x192xf32>
    %c0_3 = arith.constant 0 : index
    %c0_4 = arith.constant 0 : index
    %3 = vector.load %arg4[%c0_3, %c0_4] : memref<64x256xf32, #tpu.memory_space<vmem>>, vector<64x256xf32>
    %cst_5 = arith.constant dense<0.000000e+00> : vector<128x256xf32>
    %4 = tpu.matmul %0, %3, %cst_5 {dimension_numbers = #tpu.dot_dimension_numbers<[1], [0], [0], [1], [0, 0, 1, 1], [], []>} : vector<128x64xf32>, vector<64x256xf32>, vector<128x256xf32> -> vector<128x256xf32>
    %c0_6 = arith.constant 0 : index
    %c0_7 = arith.constant 0 : index
    %5 = vector.load %arg1[%c0_6, %c0_7] : memref<128x24xf32, #tpu.memory_space<vmem>>, vector<128x24xf32>
    %c0_8 = arith.constant 0 : index
    %c0_9 = arith.constant 0 : index
    %6 = vector.load %arg5[%c0_8, %c0_9] : memref<24x192xf32, #tpu.memory_space<vmem>>, vector<24x192xf32>
    %cst_10 = arith.constant dense<0.000000e+00> : vector<128x192xf32>
    %7 = tpu.matmul %5, %6, %cst_10 {dimension_numbers = #tpu.dot_dimension_numbers<[1], [0], [0], [1], [0, 0, 1, 1], [], []>} : vector<128x24xf32>, vector<24x192xf32>, vector<128x192xf32> -> vector<128x192xf32>
    %8 = arith.mulf %2, %7 : vector<128x192xf32>
    %c0_11 = arith.constant 0 : index
    %c0_12 = arith.constant 0 : index
    %9 = vector.load %arg7[%c0_11, %c0_12] : memref<192x32xf32, #tpu.memory_space<vmem>>, vector<192x32xf32>
    %cst_13 = arith.constant dense<0.000000e+00> : vector<128x32xf32>
    %10 = tpu.matmul %8, %9, %cst_13 {dimension_numbers = #tpu.dot_dimension_numbers<[1], [0], [0], [1], [0, 0, 1, 1], [], []>} : vector<128x192xf32>, vector<192x32xf32>, vector<128x32xf32> -> vector<128x32xf32>
    %c0_14 = arith.constant 0 : index
    %c0_15 = arith.constant 0 : index
    %11 = vector.load %arg8[%c0_14, %c0_15] : memref<1x32xf32, #tpu.memory_space<vmem>>, vector<1x32xf32>
    %12 = vector.broadcast %11 : vector<1x32xf32> to vector<128x32xf32>
    %13 = arith.addf %10, %12 : vector<128x32xf32>
    %cst_16 = arith.constant 0.000000e+00 : f32
    %14 = vector.broadcast %cst_16 : f32 to vector<128x32xf32>
    %15 = arith.maximumf %13, %14 : vector<128x32xf32>
    %c0_17 = arith.constant 0 : index
    %c0_18 = arith.constant 0 : index
    %16 = vector.load %arg6[%c0_17, %c0_18] : memref<32x256xf32, #tpu.memory_space<vmem>>, vector<32x256xf32>
    %cst_19 = arith.constant dense<0.000000e+00> : vector<128x256xf32>
    %17 = tpu.matmul %15, %16, %cst_19 {dimension_numbers = #tpu.dot_dimension_numbers<[1], [0], [0], [1], [0, 0, 1, 1], [], []>} : vector<128x32xf32>, vector<32x256xf32>, vector<128x256xf32> -> vector<128x256xf32>
    %18 = arith.mulf %4, %17 : vector<128x256xf32>
    %c0_20 = arith.constant 0 : index
    %c0_21 = arith.constant 0 : index
    %19 = vector.load %arg9[%c0_20, %c0_21] : memref<256x32xf32, #tpu.memory_space<vmem>>, vector<256x32xf32>
    %cst_22 = arith.constant dense<0.000000e+00> : vector<128x32xf32>
    %20 = tpu.matmul %18, %19, %cst_22 {dimension_numbers = #tpu.dot_dimension_numbers<[1], [0], [0], [1], [0, 0, 1, 1], [], []>} : vector<128x256xf32>, vector<256x32xf32>, vector<128x32xf32> -> vector<128x32xf32>
    %c0_23 = arith.constant 0 : index
    %c0_24 = arith.constant 0 : index
    %21 = vector.load %arg10[%c0_23, %c0_24] : memref<1x32xf32, #tpu.memory_space<vmem>>, vector<1x32xf32>
    %22 = vector.broadcast %21 : vector<1x32xf32> to vector<128x32xf32>
    %23 = arith.addf %20, %22 : vector<128x32xf32>
    %cst_25 = arith.constant 0.000000e+00 : f32
    %24 = vector.broadcast %cst_25 : f32 to vector<128x32xf32>
    %25 = arith.maximumf %23, %24 : vector<128x32xf32>
    %c0_26 = arith.constant 0 : index
    %c0_27 = arith.constant 0 : index
    %26 = vector.load %arg6[%c0_26, %c0_27] : memref<32x256xf32, #tpu.memory_space<vmem>>, vector<32x256xf32>
    %cst_28 = arith.constant dense<0.000000e+00> : vector<128x256xf32>
    %27 = tpu.matmul %25, %26, %cst_28 {dimension_numbers = #tpu.dot_dimension_numbers<[1], [0], [0], [1], [0, 0, 1, 1], [], []>} : vector<128x32xf32>, vector<32x256xf32>, vector<128x256xf32> -> vector<128x256xf32>
    %28 = arith.mulf %4, %27 : vector<128x256xf32>
    %c0_29 = arith.constant 0 : index
    %c0_30 = arith.constant 0 : index
    %29 = vector.load %arg11[%c0_29, %c0_30] : memref<256x24xf32, #tpu.memory_space<vmem>>, vector<256x24xf32>
    %cst_31 = arith.constant dense<0.000000e+00> : vector<128x24xf32>
    %30 = tpu.matmul %28, %29, %cst_31 {dimension_numbers = #tpu.dot_dimension_numbers<[1], [0], [0], [1], [0, 0, 1, 1], [], []>} : vector<128x256xf32>, vector<256x24xf32>, vector<128x24xf32> -> vector<128x24xf32>
    %c0_32 = arith.constant 0 : index
    %c0_33 = arith.constant 0 : index
    %31 = vector.load %arg12[%c0_32, %c0_33] : memref<1x24xf32, #tpu.memory_space<vmem>>, vector<1x24xf32>
    %32 = vector.broadcast %31 : vector<1x24xf32> to vector<128x24xf32>
    %33 = arith.addf %30, %32 : vector<128x24xf32>
    %cst_34 = arith.constant 0.000000e+00 : f32
    %34 = vector.broadcast %cst_34 : f32 to vector<128x24xf32>
    %35 = arith.maximumf %33, %34 : vector<128x24xf32>
    %c0_35 = arith.constant 0 : index
    %c0_36 = arith.constant 0 : index
    %36 = vector.load %arg13[%c0_35, %c0_36] : memref<24x54xf32, #tpu.memory_space<vmem>>, vector<24x54xf32>
    %cst_37 = arith.constant dense<0.000000e+00> : vector<128x54xf32>
    %37 = tpu.matmul %35, %36, %cst_37 {dimension_numbers = #tpu.dot_dimension_numbers<[1], [0], [0], [1], [0, 0, 1, 1], [], []>} : vector<128x24xf32>, vector<24x54xf32>, vector<128x54xf32> -> vector<128x54xf32>
    %c0_38 = arith.constant 0 : index
    %c0_39 = arith.constant 0 : index
    %38 = vector.load %arg14[%c0_38, %c0_39] : memref<1x54xf32, #tpu.memory_space<vmem>>, vector<1x54xf32>
    %39 = vector.broadcast %38 : vector<1x54xf32> to vector<128x54xf32>
    %40 = arith.addf %37, %39 : vector<128x54xf32>
    %cst_40 = arith.constant 0.000000e+00 : f32
    %41 = vector.broadcast %cst_40 : f32 to vector<128x54xf32>
    %42 = arith.maximumf %40, %41 : vector<128x54xf32>
    %c0_41 = arith.constant 0 : index
    %c0_42 = arith.constant 0 : index
    %43 = vector.load %arg15[%c0_41, %c0_42] : memref<54x128xf32, #tpu.memory_space<vmem>>, vector<54x128xf32>
    %cst_43 = arith.constant dense<0.000000e+00> : vector<128x128xf32>
    %44 = tpu.matmul %42, %43, %cst_43 {dimension_numbers = #tpu.dot_dimension_numbers<[1], [0], [0], [1], [0, 0, 1, 1], [], []>} : vector<128x54xf32>, vector<54x128xf32>, vector<128x128xf32> -> vector<128x128xf32>
    %c0_44 = arith.constant 0 : index
    %c0_45 = arith.constant 0 : index
    %45 = vector.load %arg16[%c0_44, %c0_45] : memref<1x128xf32, #tpu.memory_space<vmem>>, vector<1x128xf32>
    %46 = vector.broadcast %45 : vector<1x128xf32> to vector<128x128xf32>
    %47 = arith.addf %44, %46 : vector<128x128xf32>
    %c0_46 = arith.constant 0 : index
    %c0_47 = arith.constant 0 : index
    %48 = vector.load %arg17[%c0_46, %c0_47] : memref<128x128xf32, #tpu.memory_space<vmem>>, vector<128x128xf32>
    tpu.vector_store %arg17[%c0_46, %c0_47], %47 {strides = array<i32>} : memref<128x128xf32, #tpu.memory_space<vmem>>, vector<128x128xf32>,
    return
  }
  func.func @transform_0(%arg0: i32) -> (i32, i32) {
    %c0_i32 = arith.constant 0 : i32
    %c0_i32_0 = arith.constant 0 : i32
    return %arg0, %c0_i32 : i32, i32
  }
  func.func @transform_1(%arg0: i32) -> (i32, i32) {
    %c0_i32 = arith.constant 0 : i32
    %c0_i32_0 = arith.constant 0 : i32
    return %arg0, %c0_i32 : i32, i32
  }
  func.func @transform_2(%arg0: i32) -> (i32, i32) {
    %c0_i32 = arith.constant 0 : i32
    %c0_i32_0 = arith.constant 0 : i32
    %c0_i32_1 = arith.constant 0 : i32
    return %c0_i32, %c0_i32_0 : i32, i32
  }
  func.func @transform_3(%arg0: i32) -> (i32, i32) {
    %c0_i32 = arith.constant 0 : i32
    %c0_i32_0 = arith.constant 0 : i32
    %c0_i32_1 = arith.constant 0 : i32
    return %c0_i32, %c0_i32_0 : i32, i32
  }
  func.func @transform_4(%arg0: i32) -> (i32, i32) {
    %c0_i32 = arith.constant 0 : i32
    %c0_i32_0 = arith.constant 0 : i32
    %c0_i32_1 = arith.constant 0 : i32
    return %c0_i32, %c0_i32_0 : i32, i32
  }
  func.func @transform_5(%arg0: i32) -> (i32, i32) {
    %c0_i32 = arith.constant 0 : i32
    %c0_i32_0 = arith.constant 0 : i32
    %c0_i32_1 = arith.constant 0 : i32
    return %c0_i32, %c0_i32_0 : i32, i32
  }
  func.func @transform_6(%arg0: i32) -> (i32, i32) {
    %c0_i32 = arith.constant 0 : i32
    %c0_i32_0 = arith.constant 0 : i32
    %c0_i32_1 = arith.constant 0 : i32
    return %c0_i32, %c0_i32_0 : i32, i32
  }
  func.func @transform_7(%arg0: i32) -> (i32, i32) {
    %c0_i32 = arith.constant 0 : i32
    %c0_i32_0 = arith.constant 0 : i32
    %c0_i32_1 = arith.constant 0 : i32
    return %c0_i32, %c0_i32_0 : i32, i32
  }
  func.func @transform_8(%arg0: i32) -> (i32, i32) {
    %c0_i32 = arith.constant 0 : i32
    %c0_i32_0 = arith.constant 0 : i32
    %c0_i32_1 = arith.constant 0 : i32
    return %c0_i32, %c0_i32_0 : i32, i32
  }
  func.func @transform_9(%arg0: i32) -> (i32, i32) {
    %c0_i32 = arith.constant 0 : i32
    %c0_i32_0 = arith.constant 0 : i32
    %c0_i32_1 = arith.constant 0 : i32
    return %c0_i32, %c0_i32_0 : i32, i32
  }
  func.func @transform_10(%arg0: i32) -> (i32, i32) {
    %c0_i32 = arith.constant 0 : i32
    %c0_i32_0 = arith.constant 0 : i32
    %c0_i32_1 = arith.constant 0 : i32
    return %c0_i32, %c0_i32_0 : i32, i32
  }
  func.func @transform_11(%arg0: i32) -> (i32, i32) {
    %c0_i32 = arith.constant 0 : i32
    %c0_i32_0 = arith.constant 0 : i32
    %c0_i32_1 = arith.constant 0 : i32
    return %c0_i32, %c0_i32_0 : i32, i32
  }
  func.func @transform_12(%arg0: i32) -> (i32, i32) {
    %c0_i32 = arith.constant 0 : i32
    %c0_i32_0 = arith.constant 0 : i32
    %c0_i32_1 = arith.constant 0 : i32
    return %c0_i32, %c0_i32_0 : i32, i32
  }
  func.func @transform_13(%arg0: i32) -> (i32, i32) {
    %c0_i32 = arith.constant 0 : i32
    %c0_i32_0 = arith.constant 0 : i32
    %c0_i32_1 = arith.constant 0 : i32
    return %c0_i32, %c0_i32_0 : i32, i32
  }
  func.func @transform_14(%arg0: i32) -> (i32, i32) {
    %c0_i32 = arith.constant 0 : i32
    %c0_i32_0 = arith.constant 0 : i32
    %c0_i32_1 = arith.constant 0 : i32
    return %c0_i32, %c0_i32_0 : i32, i32
  }
  func.func @transform_15(%arg0: i32) -> (i32, i32) {
    %c0_i32 = arith.constant 0 : i32
    %c0_i32_0 = arith.constant 0 : i32
    %c0_i32_1 = arith.constant 0 : i32
    return %c0_i32, %c0_i32_0 : i32, i32
  }
  func.func @transform_16(%arg0: i32) -> (i32, i32) {
    %c0_i32 = arith.constant 0 : i32
    %c0_i32_0 = arith.constant 0 : i32
    return %arg0, %c0_i32 : i32, i32
  }
}

</mosaic_0001>

<bundles_post_ra>
// kernel: tpu_custom_call.1
= control target key start
LH: loop header
LB: loop body
LE: loop exit
PB: predicated region body
PF: predicated region fallthrough
CT: control target
= control target key end

     0   :  { %s4680_s0 = inlined_call_operand.vmem [shape: f32[256,24], index: 0, kind: input, shape index: {}]   ;;  %s4681_s1 = inlined_call_operand.vmem [shape: f32[256,64], index: 1, kind: input, shape index: {}]   ;;  %s4682_s2 = inlined_call_operand.vmem [shape: f32[64,192], index: 2, kind: input, shape index: {}]   ;;  %s4683_s3 = inlined_call_operand.vmem [shape: f32[64,256], index: 3, kind: input, shape index: {}]   ;;  %s4684_s4 = inlined_call_operand.vmem [shape: f32[24,192], index: 4, kind: input, shape index: {}]   ;;  %s4685_s5 = inlined_call_operand.vmem [shape: f32[32,256], index: 5, kind: input, shape index: {}]   ;;  %s4686_s6 = inlined_call_operand.vmem [shape: f32[192,32], index: 6, kind: input, shape index: {}]   ;;  %s4687_s7 = inlined_call_operand.vmem [shape: f32[1,32], index: 7, kind: input, shape index: {}]   ;;  %s4688_s8 = inlined_call_operand.vmem [shape: f32[256,32], index: 8, kind: input, shape index: {}]   ;;  %s4689_s9 = inlined_call_operand.vmem [shape: f32[1,32], index: 9, kind: input, shape index: {}]   ;;  %s4690_s10 = inlined_call_operand.vmem [shape: f32[256,24], index: 10, kind: input, shape index: {}]   ;;  %s4691_s11 = inlined_call_operand.vmem [shape: f32[1,24], index: 11, kind: input, shape index: {}]   ;;  %s4692_s12 = inlined_call_operand.vmem [shape: f32[24,54], index: 12, kind: input, shape index: {}]   ;;  %s4693_s13 = inlined_call_operand.vmem [shape: f32[1,54], index: 13, kind: input, shape index: {}]   ;;  %s4694_s14 = inlined_call_operand.vmem [shape: f32[54,128], index: 14, kind: input, shape index: {}]   ;;  %s4695_s15 = inlined_call_operand.vmem [shape: f32[1,128], index: 15, kind: input, shape index: {}]   ;;  %s4696_s16 = inlined_call_operand.hbm [shape: f32[256,128], index: 16, kind: output, shape index: {}]  }
   0x1   :  { %4702 = sst [smem:[#allocation10_spill]] %s4680_s0 }
   0x2   :  { %21 = vsyncpa [#allocation3], 0 }
   0x3   :  { %23 = vsyncpa [#allocation3 + $0x1], 0  ;;  %s3506_s21 = smov 0   ;;  %s3508_s22 = smov 0  }
   0x4   :  { %s3510_s23 = smov 0   ;;  %s3512_s24 = smov 0  }
   0x5 LB: > { %4703 = sst [smem:[#allocation5_spill]] %s3403_s21  ;;  %s3527_s25 = sadd.s32 4294967295, %s3415_s24   ;;  %s3415_s24 = sphi %s3512_s24, %s4713_s24   ;;  %s3411_s23 = sphi %s3510_s23, %s4715_s23   ;;  %s3407_s22 = sphi %s3508_s22, %s4717_s22   ;;  %s3403_s21 = sphi %s3506_s21, %s4716_s21  }
   0x6   : > { %4704 = sst [smem:[#allocation6_spill]] %s3411_s23  ;;  %s2894_s26 = sadd.s32 4294967294, %s3415_s24  }
   0x7   : > { %s3531_s27 = sadd.s32 1, %s3415_s24   ;;  %s382_s28 = sadd.s32 1, %s3411_s23 }
   0x8   : > { %4705 = sst [smem:[#allocation7_spill]] %s3531_s27  ;;  %s379_s29 = ssub.s32 %s3415_s24, %s3531_s27 }
   0x9   : > { %p392_p0 = scmp.ne.s32.totalorder %s3411_s23, %s3407_s22  ;;  %p380_p1 = scmp.eq.s32.totalorder %s379_s29, 0 }
   0xa   : > { %p393_p2 = scmp.eq.s32.totalorder %s3527_s25, 1  ;;  %p398_p3 = scmp.ne.s32.totalorder %s3407_s22, %s3403_s21 }
   0xb   : > { %p399_p4 = scmp.eq.s32.totalorder %s2894_s26, 1  ;;  %p2897_p7 = scmp.ge.s32.totalorder %s3415_s24, 1 }
   0xc   : > { %s3542_s30 = scalar_select %p380_p1, %s3411_s23, %s382_s28  }
   0xd   : > { %p3544_p5 = por %p393_p2, %p392_p0  ;;  %p3548_p6 = por %p399_p4, %p398_p3 }
   0xe   : > { %4706 = sst [smem:[#allocation8_spill]] %s3542_s30  ;;  %p477_p8 = scmp.lt.s32.totalorder %s3415_s24, 3 }
   0xf   : > { %s4708_s17 = scalar_select %p3548_p6, 1, 0 }
  0x10   : > { %p478_p9 = pnand %p2897_p7, %p477_p8 }
  0x11   : > { %4709 = sst [smem:[#allocation9_spill]] %s4708_s17  ;;  %s2899_s30 = sshll.u32 (!%p478_p9), %s3527_s25, 4 }
  0x12   : > { %481 = sbr.rel (%p478_p9) target bundleno = 1768 (0x6e8), region = 84  ;;  %p533_p10 = scmp.lt.s32.totalorder (!%p478_p9), %s2899_s30, 31 }
  0x13   : > { %s4710_s21 = sld [smem:[#allocation10_spill]] (!%p478_p9)  ;;  %s3042_s28 = sshll.u32 (!%p478_p9), %s3527_s25, 11 }
  0x17   : > { %v576_v0 = vld [vmem:[%s4682_s2 + $0x78] sm:$0xff]  ;;  %v575_v1 = vld [vmem:[%s4682_s2 + $0x70] sm:$0xff]  ;;  %v574_v2 = vld [vmem:[%s4682_s2 + $0x68] sm:$0xff]  ;;  %v3417_v4 = vmov 0.0   ;;  %s4719_s30 = smov (!%p533_p10, %s2899_s30), 31  ;;  %vm577_vm0 = vcmask 523264  }
  0x18   : > { %642 = vmatprep.subr.mxu0 %v576_v0  ;;  %v573_v3 = vld [vmem:[%s4682_s2 + $0x60] sm:$0xff]  ;;  %690 = vmatprep.mubr.f32.mxu0 %v3417_v4  ;;  %v572_v5 = vld [vmem:[%s4682_s2 + $0x58] sm:$0xff]  ;;  %v571_v6 = vld [vmem:[%s4682_s2 + $0x50] sm:$0xff]  ;;  %s2900_s17 = sshll.u32 %s4719_s30, 3  ;;  %vm986_vm1 = vcmask 195584   ;;  %vm1476_vm2 = vcmask 261120  }
  0x19   : > { %643 = vmatpush1.msra.mxu0 %v575_v1  ;;  %867 = vmatprep.mubr.f32.mxu1 %v3417_v4  ;;  %v570_v7 = vld [vmem:[%s4682_s2 + $0x48] sm:$0xff]  ;;  %v569_v8 = vld [vmem:[%s4682_s2 + $0x40] sm:$0xff]  ;;  %v568_v9 = vld [vmem:[%s4682_s2 + $0x38] sm:$0xff]  ;;  %s3607_s23 = scalar_lea.vmem %s4681_s1, %s2900_s17  ;;  %s3764_s27 = scalar_lea.vmem %s4710_s21, %s2900_s17  ;;  %vm2641_vm3 = vcmask 1045504   ;;  %vm2592_vm4 = vcmask 441344  }
  0x1a   : > { %644 = vmatprep.subr.mxu0 %v574_v2  ;;  %v567_v10 = vld [vmem:[%s4682_s2 + $0x30] sm:$0xff]  ;;  %v566_v11 = vld [vmem:[%s4682_s2 + $0x28] sm:$0xff]  ;;  %v565_v12 = vld [vmem:[%s4682_s2 + $0x20] sm:$0xff] }
  0x1b   : > { %645 = vmatpush1.msra.mxu0 %v573_v3  ;;  %v564_v13 = vld [vmem:[%s4682_s2 + $0x18] sm:$0xff]  ;;  %v563_v14 = vld [vmem:[%s4682_s2 + $0x10] sm:$0xff]  ;;  %v562_v15 = vld [vmem:[%s4682_s2 + $0x8] sm:$0xff] }
  0x1c   : > { %646 = vmatprep.subr.mxu0 %v572_v5  ;;  %v561_v16 = vld [vmem:[%s4682_s2] sm:$0xff]  ;;  %v985_v18 = vld [vmem:[%s4684_s4 + $0x28] sm:$0xff]  ;;  %v983_v20 = vld [vmem:[%s4684_s4 + $0x18] sm:$0xff] }
  0x1d   : > { %647 = vmatpush1.msra.mxu0 %v571_v6  ;;  %v3616_v17 = vld [vmem:[%s3607_s23] sm:$0xff]  ;;  %v982_v21 = vld [vmem:[%s4684_s4 + $0x10] sm:$0xff]  ;;  %v981_v22 = vld [vmem:[%s4684_s4 + $0x8] sm:$0xff] }
  0x1e   : > { %648 = vmatprep.subr.mxu0 %v570_v7  ;;  %v984_v19 = vld [vmem:[%s4684_s4 + $0x20] sm:$0xff]  ;;  %v3637_v23 = vld [vmem:[%s3607_s23 + $0x8] sm:$0xff]  ;;  %v802_v24 = vld [vmem:[%s4683_s3 + $0x78] sm:$0xff] }
  0x1f   : > { %649 = vmatpush1.msra.mxu0 %v569_v8  ;;  %v801_v25 = vld [vmem:[%s4683_s3 + $0x70] sm:$0xff]  ;;  %v980_v26 = vld [vmem:[%s4684_s4] sm:$0xff]  ;;  %819 = vmatprep.subr.mxu1 %v802_v24  ;;  %v800_v27 = vld [vmem:[%s4683_s3 + $0x68] sm:$0xff] }
  0x20   : > { %650 = vmatprep.subr.mxu0 %v568_v9  ;;  %820 = vmatpush1.msra.mxu1 %v801_v25  ;;  %v799_v28 = vld [vmem:[%s4683_s3 + $0x60] sm:$0xff]  ;;  %v3658_v29 = vld [vmem:[%s3607_s23 + $0x10] sm:$0xff]  ;;  %v798_v30 = vld [vmem:[%s4683_s3 + $0x58] sm:$0xff] }
  0x21   : > { %651 = vmatpush1.msra.mxu0 %v567_v10  ;;  %821 = vmatprep.subr.mxu1 %v800_v27  ;;  %v797_v31 = vld [vmem:[%s4683_s3 + $0x50] sm:$0xff]  ;;  %v796_v32 = vld [vmem:[%s4683_s3 + $0x48] sm:$0xff]  ;;  %v795_v33 = vld [vmem:[%s4683_s3 + $0x40] sm:$0xff] }
  0x22   : > { %652 = vmatprep.subr.mxu0 %v566_v11  ;;  %822 = vmatpush1.msra.mxu1 %v799_v28  ;;  %v3676_v34 = vld [vmem:[%s3607_s23 + $0x18] sm:$0xff]  ;;  %v793_v36 = vld [vmem:[%s4683_s3 + $0x30] sm:$0xff]  ;;  %v792_v37 = vld [vmem:[%s4683_s3 + $0x28] sm:$0xff] }
  0x23   : > { %653 = vmatpush1.msra.mxu0 %v565_v12  ;;  %823 = vmatprep.subr.mxu1 %v798_v30  ;;  %v794_v35 = vld [vmem:[%s4683_s3 + $0x38] sm:$0xff]  ;;  %v3691_v38 = vld [vmem:[%s3607_s23 + $0x20] sm:$0xff]  ;;  %v3697_v39 = vld [vmem:[%s3607_s23 + $0x28] sm:$0xff] }
  0x24   : > { %654 = vmatprep.subr.mxu0 %v564_v13  ;;  %824 = vmatpush1.msra.mxu1 %v797_v31  ;;  %v3703_v40 = vld [vmem:[%s3607_s23 + $0x30] sm:$0xff]  ;;  %v3709_v41 = vld [vmem:[%s3607_s23 + $0x38] sm:$0xff]  ;;  %v3715_v42 = vld [vmem:[%s3607_s23 + $0x40] sm:$0xff] }
  0x25   : > { %655 = vmatpush1.msra.mxu0 %v563_v14  ;;  %825 = vmatprep.subr.mxu1 %v796_v32  ;;  %v3721_v43 = vld [vmem:[%s3607_s23 + $0x48] sm:$0xff]  ;;  %v3727_v44 = vld [vmem:[%s3607_s23 + $0x50] sm:$0xff]  ;;  %v3733_v45 = vld [vmem:[%s3607_s23 + $0x58] sm:$0xff] }
  0x26   : > { %656 = vmatprep.subr.mxu0 %v562_v15  ;;  %826 = vmatpush1.msra.mxu1 %v795_v33  ;;  %v3739_v46 = vld [vmem:[%s3607_s23 + $0x60] sm:$0xff]  ;;  %v3745_v47 = vld [vmem:[%s3607_s23 + $0x68] sm:$0xff]  ;;  %v3751_v48 = vld [vmem:[%s3607_s23 + $0x70] sm:$0xff] }
  0x27   : > { %657 = vmatpush1.msra.mxu0 %v561_v16  ;;  %827 = vmatprep.subr.mxu1 %v794_v35  ;;  %v3757_v49 = vld [vmem:[%s3607_s23 + $0x78] sm:$0xff]  ;;  %v964_v50 = vld [vmem:[%s3764_s27] sm:$0xff]  ;;  %v789_v53 = vld [vmem:[%s4683_s3 + $0x10] sm:$0xff]  ;;  %s529_s23 = sand.u32 1, %s3407_s22  }
  0x28   : > { %2903 = vmatmul.mubr.msk.f32.vlgmr.msra.gmra.mxu0 %vm577_vm0, %v3616_v17  ;;  %1061 = vmatprep.subr.mxu0 %v985_v18  ;;  %v791_v51 = vld [vmem:[%s4683_s3 + $0x20] sm:$0xff]  ;;  %v790_v52 = vld [vmem:[%s4683_s3 + $0x18] sm:$0xff]  ;;  %v965_v54 = vld [vmem:[%s3764_s27 + $0x8] sm:$0xff]  ;;  %s2898_s17 = sshll.u32 %s529_s23, 7  ;;  %s4640_s30 = scalar_lea.sflag [#allocation3], %s529_s23 }
  0x29   : > { %1062 = vmatpush1.msra.mxu0 %v984_v19  ;;  %696 = vmatprep.mubr.f32.mxu0 %v3417_v4  ;;  %v788_v55 = vld [vmem:[%s4683_s3 + $0x8] sm:$0xff]  ;;  %v787_v56 = vld [vmem:[%s4683_s3] sm:$0xff]  ;;  %v966_v57 = vld [vmem:[%s3764_s27 + $0x10] sm:$0xff]  ;;  %s4611_s26 = scalar_lea.vmem [#allocation2], %s2898_s17  ;;  %s3418_s17 = smov [#allocation2]  }
  0x2a   : > { %1063 = vmatprep.subr.mxu0 %v983_v20  ;;  %828 = vmatpush1.msra.mxu1 %v793_v36  ;;  %v1243_v58 = vld [vmem:[%s4686_s6 + $0x78] sm:$0xff]  ;;  %v1242_v60 = vld [vmem:[%s4686_s6 + $0x70] sm:$0xff]  ;;  %v1241_v61 = vld [vmem:[%s4686_s6 + $0x68] sm:$0xff]  ;;  %s2820_s21 = sshll.u32 %s4611_s26, 4  ;;  %s3359_s19 = sshll.u32 %s3418_s17, 4  ;;  %s4634_s21 = int_to_ptr.vmem [resolvable:$true] %s2820_s21  ;;  %s3360_s19 = int_to_ptr.vmem [resolvable:$false] %s3359_s19 }
  0x2b   : > { %1064 = vmatpush1.msra.mxu0 %v982_v21  ;;  %829 = vmatprep.subr.mxu1 %v792_v37  ;;  %v967_v59 = vld [vmem:[%s3764_s27 + $0x18] sm:$0xff]  ;;  %v968_v62 = vld [vmem:[%s3764_s27 + $0x20] sm:$0xff]  ;;  %v969_v0 = vld [vmem:[%s3764_s27 + $0x28] sm:$0xff]  ;;  %s3355_s25 = scalar_lea.vmem %s4634_s21, 2048  ;;  %s3361_s20 = scalar_lea.vmem %s3360_s19, 4096 }
  0x2c   : > { %2904 = vmatmul.mubr.msk.f32.gmra.mxu0 %vm577_vm0, %v3637_v23  ;;  %1065 = vmatprep.subr.mxu0 %v981_v22  ;;  %v1240_v63 = vld [vmem:[%s4686_s6 + $0x60] sm:$0xff]  ;;  %v1239_v1 = vld [vmem:[%s4686_s6 + $0x58] sm:$0xff]  ;;  %v1238_v2 = vld [vmem:[%s4686_s6 + $0x50] sm:$0xff]  ;;  %p3356_p11 = scmp.ne.s32.totalorder %s4634_s21, %s3355_s25  ;;  %p3362_p0 = scmp.lt.s32.totalorder %s4634_s21, %s3360_s19 }
  0x2d   : > { %702 = vmatprep.mubr.f32.mxu0 %v3417_v4  ;;  %1066 = vmatpush1.msra.mxu0 %v980_v26  ;;  %v970_v3 = vld [vmem:[%s3764_s27 + $0x30] sm:$0xff]  ;;  %v1237_v5 = vld [vmem:[%s4686_s6 + $0x48] sm:$0xff]  ;;  %v971_v6 = vld [vmem:[%s3764_s27 + $0x38] sm:$0xff]  ;;  %p3363_p1 = scmp.lt.s32.totalorder %s3361_s20, %s3355_s25 }
  0x2e   : > { %830 = vmatpush1.msra.mxu1 %v791_v51  ;;  %v1236_v7 = vld [vmem:[%s4686_s6 + $0x40] sm:$0xff]  ;;  %v1235_v8 = vld [vmem:[%s4686_s6 + $0x38] sm:$0xff]  ;;  %v1234_v10 = vld [vmem:[%s4686_s6 + $0x30] sm:$0xff]  ;;  %p3357_p12 = pnand %p3356_p11, %p3544_p5 }
  0x2f   : > { %831 = vmatprep.subr.mxu1 %v790_v52  ;;  %v972_v9 = vld [vmem:[%s3764_s27 + $0x40] sm:$0xff]  ;;  %v973_v11 = vld [vmem:[%s3764_s27 + $0x48] sm:$0xff]  ;;  %v974_v14 = vld [vmem:[%s3764_s27 + $0x50] sm:$0xff]  ;;  %p3364_p2 = por %p3363_p1, %p3362_p0 }
  0x30   : > { %2905 = vmatmul.mubr.msk.f32.gmra.mxu0 %vm577_vm0, %v3658_v29  ;;  %832 = vmatpush1.msra.mxu1 %v789_v53  ;;  %v1233_v12 = vld [vmem:[%s4686_s6 + $0x28] sm:$0xff]  ;;  %v1232_v13 = vld [vmem:[%s4686_s6 + $0x20] sm:$0xff]  ;;  %v1231_v15 = vld [vmem:[%s4686_s6 + $0x18] sm:$0xff]  ;;  %p3358_p13 = pneg %p3357_p12 }
  0x31   : > { %708 = vmatprep.mubr.f32.mxu0 %v3417_v4  ;;  %833 = vmatprep.subr.mxu1 %v788_v55  ;;  %v975_v16 = vld [vmem:[%s3764_s27 + $0x58] sm:$0xff]  ;;  %v1229_v18 = vld [vmem:[%s4686_s6 + $0x8] sm:$0xff]  ;;  %v976_v19 = vld [vmem:[%s3764_s27 + $0x60] sm:$0xff] }
  0x32   : > { %834 = vmatpush1.msra.mxu1 %v787_v56  ;;  %v1228_v20 = vld [vmem:[%s4686_s6] sm:$0xff]  ;;  %v977_v21 = vld [vmem:[%s3764_s27 + $0x68] sm:$0xff]  ;;  %v1251_v22 = vld [vmem:[%s4686_s6 + $0xb8] sm:$0xff]  ;;  %p3365_p3 = pnand %p3364_p2, %p3358_p13 }
  0x33   : > { %2919 = vmatmul.mubr.msk.f32.vlgmr.msra.gmra.mxu1 %vm577_vm0, %v3616_v17  ;;  %1307 = vmatprep.subr.mxu1 %v3417_v4  ;;  %v1230_v17 = vld [vmem:[%s4686_s6 + $0x10] sm:$0xff]  ;;  %v1249_v25 = vld [vmem:[%s4686_s6 + $0xa8] sm:$0xff]  ;;  %v979_v26 = vld [vmem:[%s3764_s27 + $0x78] sm:$0xff] }
  0x34   : > { %2906 = vmatmul.mubr.msk.f32.gmra.mxu0 %vm577_vm0, %v3676_v34  ;;  %873 = vmatprep.mubr.f32.mxu1 %v3417_v4  ;;  %v978_v24 = vld [vmem:[%s3764_s27 + $0x70] sm:$0xff]  ;;  %v1248_v27 = vld [vmem:[%s4686_s6 + $0xa0] sm:$0xff]  ;;  %v1247_v28 = vld [vmem:[%s4686_s6 + $0x98] sm:$0xff]  ;;  %s4632_s27 = scalar_lea.hbm %s4696_s16, %s3042_s28 }
  0x35   : > { %714 = vmatprep.mubr.f32.mxu0 %v3417_v4  ;;  %1308 = vmatpush1.msra.mxu1 %v1243_v58  ;;  %v1245_v30 = vld [vmem:[%s4686_s6 + $0x88] sm:$0xff]  ;;  %v1244_v31 = vld [vmem:[%s4686_s6 + $0x80] sm:$0xff]  ;;  %v3981_v35 = vld [vmem:[%s4685_s5 + $0x30] sm:$0xff] }
  0x36   : > { %1309 = vmatprep.subr.mxu1 %v3417_v4  ;;  %v3986_v36 = vld [vmem:[%s4685_s5 + $0x28] sm:$0xff]  ;;  %v3991_v37 = vld [vmem:[%s4685_s5 + $0x20] sm:$0xff] }
  0x37   : > { %2920 = vmatmul.mubr.msk.f32.gmra.mxu1 %vm577_vm0, %v3637_v23  ;;  %v1250_v23 = vld [vmem:[%s4686_s6 + $0xb0] sm:$0xff] }
  0x38   : > { %2907 = vmatmul.mubr.msk.f32.gmra.mxu0 %vm577_vm0, %v3691_v38  ;;  %879 = vmatprep.mubr.f32.mxu1 %v3417_v4 }
  0x39   : > { %720 = vmatprep.mubr.f32.mxu0 %v3417_v4  ;;  %1310 = vmatpush1.msra.mxu1 %v1242_v60 }
  0x3a   : > { %1311 = vmatprep.subr.mxu1 %v3417_v4 }
  0x3b   : > { %2921 = vmatmul.mubr.msk.f32.gmra.mxu1 %vm577_vm0, %v3658_v29  ;;  %v1246_v29 = vld [vmem:[%s4686_s6 + $0x90] sm:$0xff] }
  0x3c   : > { %2908 = vmatmul.mubr.msk.f32.gmra.mxu0 %vm577_vm0, %v3697_v39  ;;  %1312 = vmatpush1.msra.mxu1 %v1241_v61 }
  0x3d   : > { %726 = vmatprep.mubr.f32.mxu0 %v3417_v4  ;;  %885 = vmatprep.mubr.f32.mxu1 %v3417_v4 }
  0x3e   : > { %1313 = vmatprep.subr.mxu1 %v3417_v4 }
  0x3f   : > { %1314 = vmatpush1.msra.mxu1 %v1240_v63 }
  0x40   : > { %2909 = vmatmul.mubr.msk.f32.gmra.mxu0 %vm577_vm0, %v3703_v40  ;;  %2922 = vmatmul.mubr.msk.f32.gmra.mxu1 %vm577_vm0, %v3676_v34  ;;  %v1475_v34 = vld [vmem:[%s4685_s5 + $0x38] sm:$0xff] }
  0x41   : > { %732 = vmatprep.mubr.f32.mxu0 %v3417_v4  ;;  %1315 = vmatprep.subr.mxu1 %v3417_v4 }
  0x42   : > { %891 = vmatprep.mubr.f32.mxu1 %v3417_v4  ;;  %1316 = vmatpush1.msra.mxu1 %v1239_v1 }
  0x43   : > { %1317 = vmatprep.subr.mxu1 %v3417_v4  ;;  %1549 = vmatprep.subr.mxu0 %v1475_v34 }
  0x44   : > { %2910 = vmatmul.mubr.msk.f32.gmra.mxu0 %vm577_vm0, %v3709_v41  ;;  %2923 = vmatmul.mubr.msk.f32.gmra.mxu1 %vm577_vm0, %v3691_v38 }
  0x45   : > { %738 = vmatprep.mubr.f32.mxu0 %v3417_v4  ;;  %1318 = vmatpush1.msra.mxu1 %v1238_v2 }
  0x46   : > { %897 = vmatprep.mubr.f32.mxu1 %v3417_v4  ;;  %1319 = vmatprep.subr.mxu1 %v3417_v4 }
  0x47   : > { %1320 = vmatpush1.msra.mxu1 %v1237_v5 }
  0x48   : > { %2911 = vmatmul.mubr.msk.f32.gmra.mxu0 %vm577_vm0, %v3715_v42  ;;  %2924 = vmatmul.mubr.msk.f32.gmra.mxu1 %vm577_vm0, %v3697_v39  ;;  %v3997_v39 = vld [vmem:[%s4685_s5 + $0x18] sm:$0xff] }
  0x49   : > { %744 = vmatprep.mubr.f32.mxu0 %v3417_v4  ;;  %1321 = vmatprep.subr.mxu1 %v3417_v4 }
  0x4a   : > { %903 = vmatprep.mubr.f32.mxu1 %v3417_v4  ;;  %1322 = vmatpush1.msra.mxu1 %v1236_v7 }
  0x4b   : > { %1323 = vmatprep.subr.mxu1 %v3417_v4 }
  0x4c   : > { %2912 = vmatmul.mubr.msk.f32.gmra.mxu0 %vm577_vm0, %v3721_v43  ;;  %2925 = vmatmul.mubr.msk.f32.gmra.mxu1 %vm577_vm0, %v3703_v40  ;;  %v4003_v40 = vld [vmem:[%s4685_s5 + $0x10] sm:$0xff] }
  0x4d   : > { %750 = vmatprep.mubr.f32.mxu0 %v3417_v4  ;;  %1324 = vmatpush1.msra.mxu1 %v1235_v8 }
  0x4e   : > { %909 = vmatprep.mubr.f32.mxu1 %v3417_v4  ;;  %1325 = vmatprep.subr.mxu1 %v3417_v4 }
  0x4f   : > { %1326 = vmatpush1.msra.mxu1 %v1234_v10 }
  0x50   : > { %2913 = vmatmul.mubr.msk.f32.gmra.mxu0 %vm577_vm0, %v3727_v44  ;;  %2926 = vmatmul.mubr.msk.f32.gmra.mxu1 %vm577_vm0, %v3709_v41 }
  0x51   : > { %756 = vmatprep.mubr.f32.mxu0 %v3417_v4  ;;  %1327 = vmatprep.subr.mxu1 %v3417_v4 }
  0x52   : > { %915 = vmatprep.mubr.f32.mxu1 %v3417_v4  ;;  %1328 = vmatpush1.msra.mxu1 %v1233_v12 }
  0x53   : > { %1329 = vmatprep.subr.mxu1 %v3417_v4 }
  0x54   : > { %2914 = vmatmul.mubr.msk.f32.gmra.mxu0 %vm577_vm0, %v3733_v45  ;;  %2927 = vmatmul.mubr.msk.f32.gmra.mxu1 %vm577_vm0, %v3715_v42  ;;  %v4009_v42 = vld [vmem:[%s4685_s5 + $0x8] sm:$0xff] }
  0x55   : > { %762 = vmatprep.mubr.f32.mxu0 %v3417_v4  ;;  %1330 = vmatpush1.msra.mxu1 %v1232_v13 }
  0x56   : > { %921 = vmatprep.mubr.f32.mxu1 %v3417_v4  ;;  %1331 = vmatprep.subr.mxu1 %v3417_v4 }
  0x57   : > { %1332 = vmatpush1.msra.mxu1 %v1231_v15 }
  0x58   : > { %2915 = vmatmul.mubr.msk.f32.gmra.mxu0 %vm577_vm0, %v3739_v46  ;;  %2928 = vmatmul.mubr.msk.f32.gmra.mxu1 %vm577_vm0, %v3721_v43  ;;  %v4015_v43 = vld [vmem:[%s4685_s5] sm:$0xff] }
  0x59   : > { %768 = vmatprep.mubr.f32.mxu0 %v3417_v4  ;;  %1333 = vmatprep.subr.mxu1 %v3417_v4 }
  0x5a   : > { %927 = vmatprep.mubr.f32.mxu1 %v3417_v4  ;;  %1334 = vmatpush1.msra.mxu1 %v1230_v17 }
  0x5b   : > { %1335 = vmatprep.subr.mxu1 %v3417_v4 }
  0x5c   : > { %2916 = vmatmul.mubr.msk.f32.gmra.mxu0 %vm577_vm0, %v3745_v47  ;;  %2929 = vmatmul.mubr.msk.f32.gmra.mxu1 %vm577_vm0, %v3727_v44 }
  0x5d   : > { %774 = vmatprep.mubr.f32.mxu0 %v3417_v4  ;;  %1336 = vmatpush1.msra.mxu1 %v1229_v18 }
  0x5e   : > { %933 = vmatprep.mubr.f32.mxu1 %v3417_v4  ;;  %1337 = vmatprep.subr.mxu1 %v3417_v4 }
  0x5f   : > { %1338 = vmatpush1.msra.mxu1 %v1228_v20 }
  0x60   : > { %2917 = vmatmul.mubr.msk.f32.gmra.mxu0 %vm577_vm0, %v3751_v48  ;;  %2930 = vmatmul.mubr.msk.f32.gmra.mxu1 %vm577_vm0, %v3733_v45 }
  0x61   : > { %780 = vmatprep.mubr.f32.mxu0 %v3417_v4  ;;  %1355 = vmatprep.subr.mxu1 %v3417_v4 }
  0x62   : > { %939 = vmatprep.mubr.f32.mxu1 %v3417_v4  ;;  %1356 = vmatpush2.msra.mxu1 %v1251_v22 }
  0x63   : > { %1357 = vmatprep.subr.mxu1 %v3417_v4 }
  0x64   : > { %2918 = vmatmul.mubr.msk.f32.gmra.mxu0 %vm577_vm0, %v3757_v49  ;;  %2931 = vmatmul.mubr.msk.f32.gmra.mxu1 %vm577_vm0, %v3739_v46 }
  0x65   : > { %1099 = vmatprep.mubr.f32.mxu0 %v3417_v4  ;;  %1358 = vmatpush2.msra.mxu1 %v1250_v23 }
  0x66   : > { %945 = vmatprep.mubr.f32.mxu1 %v3417_v4  ;;  %1359 = vmatprep.subr.mxu1 %v3417_v4 }
  0x67   : > { %1360 = vmatpush2.msra.mxu1 %v1249_v25 }
  0x68   : > { %2935 = vmatmul.mubr.msk.f32.vlgmr.msra.gmra.mxu0 %vm986_vm1, %v964_v50  ;;  %2932 = vmatmul.mubr.msk.f32.gmra.mxu1 %vm577_vm0, %v3745_v47 }
  0x69   : > { %1105 = vmatprep.mubr.f32.mxu0 %v3417_v4  ;;  %1361 = vmatprep.subr.mxu1 %v3417_v4 }
  0x6a   : > { %951 = vmatprep.mubr.f32.mxu1 %v3417_v4  ;;  %1362 = vmatpush2.msra.mxu1 %v1248_v27 }
  0x6b   : > { %1363 = vmatprep.subr.mxu1 %v3417_v4  ;;  %1550 = vmatpush1.msra.mxu0 %v3981_v35 }
  0x6c   : > { %2936 = vmatmul.mubr.msk.f32.gmra.mxu0 %vm986_vm1, %v965_v54  ;;  %2933 = vmatmul.mubr.msk.f32.gmra.mxu1 %vm577_vm0, %v3751_v48 }
  0x6d   : > { %1111 = vmatprep.mubr.f32.mxu0 %v3417_v4  ;;  %1364 = vmatpush2.msra.mxu1 %v1247_v28 }
  0x6e   : > { %957 = vmatprep.mubr.f32.mxu1 %v3417_v4  ;;  %1365 = vmatprep.subr.mxu1 %v3417_v4 }
  0x6f   : > { %1366 = vmatpush2.msra.mxu1 %v1246_v29  ;;  %1551 = vmatprep.subr.mxu0 %v3986_v36 }
  0x70   : > { %2937 = vmatmul.mubr.msk.f32.gmra.mxu0 %vm986_vm1, %v966_v57  ;;  %2934 = vmatmul.mubr.msk.f32.gmra.mxu1 %vm577_vm0, %v3757_v49 }
  0x71   : > { %1117 = vmatprep.mubr.f32.mxu0 %v3417_v4  ;;  %1367 = vmatprep.subr.mxu1 %v3417_v4 }
  0x72   : > { %1368 = vmatpush2.msra.mxu1 %v1245_v30  ;;  %1552 = vmatpush1.msra.mxu0 %v3991_v37 }
  0x73   : > { %1369 = vmatprep.subr.mxu1 %v3417_v4  ;;  %1553 = vmatprep.subr.mxu0 %v3997_v39 }
  0x74   : > { %2938 = vmatmul.mubr.msk.f32.gmra.mxu0 %vm986_vm1, %v967_v59  ;;  %1370 = vmatpush2.msra.mxu1 %v1244_v31 }
  0x75   : > { %1123 = vmatprep.mubr.f32.mxu0 %v3417_v4  ;;  %1554 = vmatpush1.msra.mxu0 %v4003_v40 }
  0x76   : > { %1555 = vmatprep.subr.mxu0 %v4009_v42 }
  0x77   : > { %1556 = vmatpush1.msra.mxu0 %v4015_v43 }
  0x78   : > { %2939 = vmatmul.mubr.msk.f32.gmra.mxu0 %vm986_vm1, %v968_v62  ;;  %1990 = vmatprep.subr.mxu0 %v1475_v34 }
  0x79   : > { %1129 = vmatprep.mubr.f32.mxu0 %v3417_v4 }
  0x7c   : > { %2940 = vmatmul.mubr.msk.f32.gmra.mxu0 %vm986_vm1, %v969_v0 }
  0x7d   : > { %1135 = vmatprep.mubr.f32.mxu0 %v3417_v4 }
  0x80   : > { %2941 = vmatmul.mubr.msk.f32.gmra.mxu0 %vm986_vm1, %v970_v3 }
  0x81   : > { %1141 = vmatprep.mubr.f32.mxu0 %v3417_v4 }
  0x84   : > { %2942 = vmatmul.mubr.msk.f32.gmra.mxu0 %vm986_vm1, %v971_v6 }
  0x85   : > { %1147 = vmatprep.mubr.f32.mxu0 %v3417_v4 }
  0x88   : > { %2943 = vmatmul.mubr.msk.f32.gmra.mxu0 %vm986_vm1, %v972_v9 }
  0x89   : > { %1153 = vmatprep.mubr.f32.mxu0 %v3417_v4 }
  0x8c   : > { %2944 = vmatmul.mubr.msk.f32.gmra.mxu0 %vm986_vm1, %v973_v11 }
  0x8d   : > { %1159 = vmatprep.mubr.f32.mxu0 %v3417_v4 }
  0x90   : > { %2945 = vmatmul.mubr.msk.f32.gmra.mxu0 %vm986_vm1, %v974_v14 }
  0x91   : > { %1165 = vmatprep.mubr.f32.mxu0 %v3417_v4 }
  0x94   : > { %2946 = vmatmul.mubr.msk.f32.gmra.mxu0 %vm986_vm1, %v975_v16 }
  0x95   : > { %1171 = vmatprep.mubr.f32.mxu0 %v3417_v4 }
  0x98   : > { %2947 = vmatmul.mubr.msk.f32.gmra.mxu0 %vm986_vm1, %v976_v19 }
  0x99   : > { %1177 = vmatprep.mubr.f32.mxu0 %v3417_v4 }
  0x9c   : > { %2948 = vmatmul.mubr.msk.f32.gmra.mxu0 %vm986_vm1, %v977_v21 }
  0x9d   : > { %1183 = vmatprep.mubr.f32.mxu0 %v3417_v4 }
  0xa0   : > { %2949 = vmatmul.mubr.msk.f32.gmra.mxu0 %vm986_vm1, %v978_v24 }
  0xa1   : > { %1189 = vmatprep.mubr.f32.mxu0 %v3417_v4 }
  0xa4   : > { %2950 = vmatmul.mubr.msk.f32.gmra.mxu0 %vm986_vm1, %v979_v26 }
  0xa5   : > { %1589 = vmatprep.mubr.f32.mxu0 %v3417_v4 }
  0xe8   : > { %v692_v32 = vpop.f32.mrf.mxu0 }
  0xea   : > { %v694_v33 = vpop.f32.mrf.mxu0 }
  0xec   : > { %v698_v38 = vpop.f32.mrf.mxu0 }
  0xee   : > { %v700_v41 = vpop.f32.mrf.mxu0 }
  0xf0   : > { %v704_v44 = vpop.f32.mrf.mxu0 }
  0xf2   : > { %v706_v45 = vpop.f32.mrf.mxu0 }
  0xf4   : > { %v710_v46 = vpop.f32.mrf.mxu0 }
  0xf6   : > { %v712_v47 = vpop.f32.mrf.mxu0 }
  0xf8   : > { %v716_v48 = vpop.f32.mrf.mxu0 }
  0xfa   : > { %v718_v49 = vpop.f32.mrf.mxu0 }
  0xfc   : > { %v722_v50 = vpop.f32.mrf.mxu0 }
  0xfe   : > { %v724_v51 = vpop.f32.mrf.mxu0 }
 0x100   : > { %v728_v52 = vpop.f32.mrf.mxu0 }
 0x102   : > { %v730_v53 = vpop.f32.mrf.mxu0 }
 0x104   : > { %v4020_v54 = vpop.f32.mrf.mxu0 }
 0x106   : > { %v736_v55 = vpop.f32.mrf.mxu0 }
 0x108   : > { %v4022_v56 = vpop.f32.mrf.mxu0 }
 0x10a   : > { %v4024_v57 = vpop.f32.mrf.mxu0 }
 0x10c   : > { %v4026_v58 = vpop.f32.mrf.mxu0 }
 0x10e   : > { %v4028_v59 = vpop.f32.mrf.mxu0 }
 0x110   : > { %v4030_v60 = vpop.f32.mrf.mxu0 }
 0x112   : > { %v4032_v61 = vpop.f32.mrf.mxu0 }
 0x114   : > { %v4034_v62 = vpop.f32.mrf.mxu0 }
 0x116   : > { %v4036_v63 = vpop.f32.mrf.mxu0 }
 0x118   : > { %v4038_v0 = vpop.f32.mrf.mxu0 }
 0x11a   : > { %v4040_v1 = vpop.f32.mrf.mxu0 }
 0x11c   : > { %v4042_v2 = vpop.f32.mrf.mxu0 }
 0x11e   : > { %v4044_v3 = vpop.f32.mrf.mxu0 }
 0x120   : > { %v4046_v5 = vpop.f32.mrf.mxu0 }
 0x122   : > { %v4048_v6 = vpop.f32.mrf.mxu0 }
 0x124   : > { %v4050_v7 = vpop.f32.mrf.mxu0 }
 0x126   : > { %v4052_v8 = vpop.f32.mrf.mxu0 }
 0x128   : > { %v1101_v9 = vpop.f32.mrf.mxu0 }
 0x129   : > { %v1196_v12 = vmul.f32 %v1101_v9, %v692_v32 }
 0x12a   : > { %v1103_v10 = vpop.f32.mrf.mxu0 }
 0x12b   : > { %v1197_v11 = vmul.f32 %v1103_v10, %v694_v33 }
 0x12c   : > { %v1107_v13 = vpop.f32.mrf.mxu0 }
 0x12d   : > { %2952 = vmatprep.mubr.msk.f32.mxu1 %vm577_vm0, %v1197_v11  ;;  %v1198_v16 = vmul.f32 %v1107_v13, %v698_v38 }
 0x12e   : > { %v1109_v14 = vpop.f32.mrf.mxu0  ;;  %1372 = vmatmul.mubr.f32.vlgmr.msra.gmra.mxu1 %v1196_v12 }
 0x12f   : > { %v1199_v15 = vmul.f32 %v1109_v14, %v700_v41 }
 0x130   : > { %v1113_v17 = vpop.f32.mrf.mxu0 }
 0x131   : > { %2953 = vmatprep.mubr.msk.f32.mxu1 %vm577_vm0, %v1199_v15  ;;  %v1200_v20 = vmul.f32 %v1113_v17, %v704_v44 }
 0x132   : > { %v1115_v18 = vpop.f32.mrf.mxu0  ;;  %1377 = vmatmul.mubr.f32.gmra.mxu1 %v1198_v16 }
 0x133   : > { %v1201_v19 = vmul.f32 %v1115_v18, %v706_v45 }
 0x134   : > { %v1119_v21 = vpop.f32.mrf.mxu0 }
 0x135   : > { %2954 = vmatprep.mubr.msk.f32.mxu1 %vm577_vm0, %v1201_v19  ;;  %v1202_v24 = vmul.f32 %v1119_v21, %v710_v46 }
 0x136   : > { %v1121_v22 = vpop.f32.mrf.mxu0  ;;  %1382 = vmatmul.mubr.f32.gmra.mxu1 %v1200_v20 }
 0x137   : > { %v1203_v23 = vmul.f32 %v1121_v22, %v712_v47 }
 0x138   : > { %v1125_v25 = vpop.f32.mrf.mxu0 }
 0x139   : > { %2955 = vmatprep.mubr.msk.f32.mxu1 %vm577_vm0, %v1203_v23  ;;  %v1204_v28 = vmul.f32 %v1125_v25, %v716_v48 }
 0x13a   : > { %v1127_v26 = vpop.f32.mrf.mxu0  ;;  %1387 = vmatmul.mubr.f32.gmra.mxu1 %v1202_v24 }
 0x13b   : > { %v1205_v27 = vmul.f32 %v1127_v26, %v718_v49 }
 0x13c   : > { %v1131_v29 = vpop.f32.mrf.mxu0 }
 0x13d   : > { %2956 = vmatprep.mubr.msk.f32.mxu1 %vm577_vm0, %v1205_v27  ;;  %v1206_v32 = vmul.f32 %v1131_v29, %v722_v50 }
 0x13e   : > { %v1133_v30 = vpop.f32.mrf.mxu0  ;;  %1392 = vmatmul.mubr.f32.gmra.mxu1 %v1204_v28 }
 0x13f   : > { %v1207_v31 = vmul.f32 %v1133_v30, %v724_v51 }
 0x140   : > { %v1137_v33 = vpop.f32.mrf.mxu0 }
 0x141   : > { %2957 = vmatprep.mubr.msk.f32.mxu1 %vm577_vm0, %v1207_v31  ;;  %v1208_v41 = vmul.f32 %v1137_v33, %v728_v52  ;;  %v1749_v33 = vld [vmem:[%s4688_s8 + $0xf8] sm:$0xff] }
 0x142   : > { %v1139_v34 = vpop.f32.mrf.mxu0  ;;  %1397 = vmatmul.mubr.f32.gmra.mxu1 %v1206_v32  ;;  %3043 = vmatprep.subr.mxu1 %v1749_v33 }
 0x143   : > { %v1209_v38 = vmul.f32 %v1139_v34, %v730_v53  ;;  %v1733_v34 = vld [vmem:[%s4688_s8 + $0x78] sm:$0xff] }
 0x144   : > { %v1143_v44 = vpop.f32.mrf.mxu0  ;;  %3044 = vmatpush3.msra.mxu1 %v1733_v34 }
 0x145   : > { %2958 = vmatprep.mubr.msk.f32.mxu1 %vm577_vm0, %v1209_v38  ;;  %v1210_v47 = vmul.f32 %v1143_v44, %v4020_v54  ;;  %v1748_v38 = vld [vmem:[%s4688_s8 + $0xf0] sm:$0xff] }
 0x146   : > { %v1145_v45 = vpop.f32.mrf.mxu0  ;;  %1402 = vmatmul.mubr.f32.gmra.mxu1 %v1208_v41  ;;  %v1732_v44 = vld [vmem:[%s4688_s8 + $0x70] sm:$0xff]  ;;  %3045 = vmatprep.subr.mxu1 %v1748_v38 }
 0x147   : > { %v1211_v46 = vmul.f32 %v1145_v45, %v736_v55  ;;  %v1747_v45 = vld [vmem:[%s4688_s8 + $0xe8] sm:$0xff]  ;;  %3046 = vmatpush3.msra.mxu1 %v1732_v44 }
 0x148   : > { %v1149_v48 = vpop.f32.mrf.mxu0  ;;  %3047 = vmatprep.subr.mxu1 %v1747_v45 }
 0x149   : > { %2959 = vmatprep.mubr.msk.f32.mxu1 %vm577_vm0, %v1211_v46  ;;  %v1212_v51 = vmul.f32 %v1149_v48, %v4022_v56  ;;  %v1731_v46 = vld [vmem:[%s4688_s8 + $0x68] sm:$0xff] }
 0x14a   : > { %v1151_v49 = vpop.f32.mrf.mxu0  ;;  %1407 = vmatmul.mubr.f32.gmra.mxu1 %v1210_v47  ;;  %v1746_v47 = vld [vmem:[%s4688_s8 + $0xe0] sm:$0xff] }
 0x14b   : > { %v1213_v50 = vmul.f32 %v1151_v49, %v4024_v57  ;;  %v1730_v49 = vld [vmem:[%s4688_s8 + $0x60] sm:$0xff]  ;;  %3048 = vmatpush3.msra.mxu1 %v1731_v46 }
 0x14c   : > { %v1155_v9 = vpop.f32.mrf.mxu0  ;;  %3049 = vmatprep.subr.mxu1 %v1746_v47  ;;  %v4244_v47 = vld [vmem:[%s4687_s7] ss:$0 sm:$0xff] }
 0x14d   : > { %2960 = vmatprep.mubr.msk.f32.mxu1 %vm577_vm0, %v1213_v50  ;;  %v1214_v55 = vmul.f32 %v1155_v9, %v4026_v58  ;;  %v1745_v50 = vld [vmem:[%s4688_s8 + $0xd8] sm:$0xff]  ;;  %3050 = vmatpush3.msra.mxu1 %v1730_v49  ;;  %v1744_v9 = vld [vmem:[%s4688_s8 + $0xd0] sm:$0xff] }
 0x14e   : > { %v1157_v52 = vpop.f32.mrf.mxu0  ;;  %1412 = vmatmul.mubr.f32.gmra.mxu1 %v1212_v51  ;;  %v1729_v51 = vld [vmem:[%s4688_s8 + $0x58] sm:$0xff]  ;;  %3051 = vmatprep.subr.mxu1 %v1745_v50 }
 0x14f   : > { %v1215_v53 = vmul.f32 %v1157_v52, %v4028_v59  ;;  %3052 = vmatpush3.msra.mxu1 %v1729_v51 }
 0x150   : > { %v1161_v10 = vpop.f32.mrf.mxu0  ;;  %3053 = vmatprep.subr.mxu1 %v1744_v9 }
 0x151   : > { %2961 = vmatprep.mubr.msk.f32.mxu1 %vm577_vm0, %v1215_v53  ;;  %v1216_v57 = vmul.f32 %v1161_v10, %v4030_v60  ;;  %v1728_v53 = vld [vmem:[%s4688_s8 + $0x50] sm:$0xff]  ;;  %v1727_v10 = vld [vmem:[%s4688_s8 + $0x48] sm:$0xff] }
 0x152   : > { %v1163_v54 = vpop.f32.mrf.mxu0  ;;  %1417 = vmatmul.mubr.f32.gmra.mxu1 %v1214_v55  ;;  %v1743_v55 = vld [vmem:[%s4688_s8 + $0xc8] sm:$0xff] }
 0x153   : > { %v1217_v11 = vmul.f32 %v1163_v54, %v4032_v61  ;;  %3054 = vmatpush3.msra.mxu1 %v1728_v53  ;;  %v1742_v54 = vld [vmem:[%s4688_s8 + $0xc0] sm:$0xff] }
 0x154   : > { %v1167_v12 = vpop.f32.mrf.mxu0  ;;  %3055 = vmatprep.subr.mxu1 %v1743_v55 }
 0x155   : > { %2962 = vmatprep.mubr.msk.f32.mxu1 %vm577_vm0, %v1217_v11  ;;  %v1218_v59 = vmul.f32 %v1167_v12, %v4034_v62  ;;  %3056 = vmatpush3.msra.mxu1 %v1727_v10  ;;  %v1741_v12 = vld [vmem:[%s4688_s8 + $0xb8] sm:$0xff] }
 0x156   : > { %v1169_v56 = vpop.f32.mrf.mxu0  ;;  %1422 = vmatmul.mubr.f32.gmra.mxu1 %v1216_v57  ;;  %v1726_v57 = vld [vmem:[%s4688_s8 + $0x40] sm:$0xff]  ;;  %3057 = vmatprep.subr.mxu1 %v1742_v54 }
 0x157   : > { %v1219_v13 = vmul.f32 %v1169_v56, %v4036_v63  ;;  %v1725_v56 = vld [vmem:[%s4688_s8 + $0x38] sm:$0xff]  ;;  %3058 = vmatpush3.msra.mxu1 %v1726_v57 }
 0x158   : > { %v1173_v14 = vpop.f32.mrf.mxu0  ;;  %3059 = vmatprep.subr.mxu1 %v1741_v12 }
 0x159   : > { %2963 = vmatprep.mubr.msk.f32.mxu1 %vm577_vm0, %v1219_v13  ;;  %v1220_v61 = vmul.f32 %v1173_v14, %v4038_v0  ;;  %v1740_v13 = vld [vmem:[%s4688_s8 + $0xb0] sm:$0xff]  ;;  %3060 = vmatpush3.msra.mxu1 %v1725_v56 }
 0x15a   : > { %v1175_v58 = vpop.f32.mrf.mxu0  ;;  %1427 = vmatmul.mubr.f32.gmra.mxu1 %v1218_v59  ;;  %v1724_v14 = vld [vmem:[%s4688_s8 + $0x30] sm:$0xff]  ;;  %3061 = vmatprep.subr.mxu1 %v1740_v13 }
 0x15b   : > { %v1221_v15 = vmul.f32 %v1175_v58, %v4040_v1  ;;  %v1739_v58 = vld [vmem:[%s4688_s8 + $0xa8] sm:$0xff]  ;;  %3062 = vmatpush3.msra.mxu1 %v1724_v14 }
 0x15c   : > { %v1179_v16 = vpop.f32.mrf.mxu0  ;;  %3063 = vmatprep.subr.mxu1 %v1739_v58 }
 0x15d   : > { %2964 = vmatprep.mubr.msk.f32.mxu1 %vm577_vm0, %v1221_v15  ;;  %v1222_v63 = vmul.f32 %v1179_v16, %v4042_v2  ;;  %v4087_v2 = vpop.f32.mrf.mxu1  ;;  %v1723_v15 = vld [vmem:[%s4688_s8 + $0x28] sm:$0xff] }
 0x15e   : > { %v1181_v60 = vpop.f32.mrf.mxu0  ;;  %1432 = vmatmul.mubr.f32.gmra.mxu1 %v1220_v61  ;;  %v1738_v61 = vld [vmem:[%s4688_s8 + $0xa0] sm:$0xff] }
 0x15f   : > { %v1223_v17 = vmul.f32 %v1181_v60, %v4044_v3  ;;  %v4089_v22 = vpop.f32.mrf.mxu1  ;;  %v1722_v60 = vld [vmem:[%s4688_s8 + $0x20] sm:$0xff]  ;;  %3064 = vmatpush3.msra.mxu1 %v1723_v15 }
 0x160   : > { %v1185_v18 = vpop.f32.mrf.mxu0  ;;  %3065 = vmatprep.subr.mxu1 %v1738_v61 }
 0x161   : > { %2965 = vmatprep.mubr.msk.f32.mxu1 %vm577_vm0, %v1223_v17  ;;  %v1224_v1 = vmul.f32 %v1185_v18, %v4046_v5  ;;  %v4091_v23 = vpop.f32.mrf.mxu1  ;;  %v1737_v17 = vld [vmem:[%s4688_s8 + $0x98] sm:$0xff]  ;;  %3066 = vmatpush3.msra.mxu1 %v1722_v60  ;;  %v1736_v18 = vld [vmem:[%s4688_s8 + $0x90] sm:$0xff] }
 0x162   : > { %v1187_v62 = vpop.f32.mrf.mxu0  ;;  %1437 = vmatmul.mubr.f32.gmra.mxu1 %v1222_v63  ;;  %v1721_v63 = vld [vmem:[%s4688_s8 + $0x18] sm:$0xff]  ;;  %3067 = vmatprep.subr.mxu1 %v1737_v17 }
 0x163   : > { %v1225_v19 = vmul.f32 %v1187_v62, %v4048_v6  ;;  %v4093_v6 = vpop.f32.mrf.mxu1  ;;  %3068 = vmatpush3.msra.mxu1 %v1721_v63 }
 0x164   : > { %v1191_v20 = vpop.f32.mrf.mxu0  ;;  %3069 = vmatprep.subr.mxu1 %v1736_v18 }
 0x165   : > { %2966 = vmatprep.mubr.msk.f32.mxu1 %vm577_vm0, %v1225_v19  ;;  %v1226_v3 = vmul.f32 %v1191_v20, %v4050_v7  ;;  %v4095_v5 = vpop.f32.mrf.mxu1  ;;  %v1720_v19 = vld [vmem:[%s4688_s8 + $0x10] sm:$0xff]  ;;  %v1719_v20 = vld [vmem:[%s4688_s8 + $0x8] sm:$0xff] }
 0x166   : > { %v1193_v0 = vpop.f32.mrf.mxu0  ;;  %1442 = vmatmul.mubr.f32.gmra.mxu1 %v1224_v1  ;;  %v1735_v1 = vld [vmem:[%s4688_s8 + $0x88] sm:$0xff] }
 0x167   : > { %v1227_v21 = vmul.f32 %v1193_v0, %v4052_v8  ;;  %v4097_v24 = vpop.f32.mrf.mxu1  ;;  %3070 = vmatpush3.msra.mxu1 %v1720_v19 }
 0x168   : > { %3071 = vmatprep.subr.mxu1 %v1735_v1 }
 0x169   : > { %2967 = vmatprep.mubr.msk.f32.mxu1 %vm577_vm0, %v1227_v21  ;;  %v4099_v25 = vpop.f32.mrf.mxu1  ;;  %3072 = vmatpush3.msra.mxu1 %v1719_v20 }
 0x16a   : > { %1447 = vmatmul.mubr.f32.gmra.mxu1 %v1226_v3 }
 0x16b   : > { %v4101_v8 = vpop.f32.mrf.mxu1 }
 0x16d   : > { %v4103_v7 = vpop.f32.mrf.mxu1 }
 0x16f   : > { %v4105_v26 = vpop.f32.mrf.mxu1 }
 0x171   : > { %v4107_v27 = vpop.f32.mrf.mxu1 }
 0x173   : > { %v4109_v28 = vpop.f32.mrf.mxu1 }
 0x175   : > { %v4111_v29 = vpop.f32.mrf.mxu1 }
 0x177   : > { %v4113_v30 = vpop.f32.mrf.mxu1 }
 0x179   : > { %v4115_v31 = vpop.f32.mrf.mxu1 }
 0x17b   : > { %v4117_v32 = vpop.f32.mrf.mxu1 }
 0x17d   : > { %v4128_v41 = vpop.f32.mrf.mxu1 }
 0x17f   : > { %v4142_v48 = vpop.f32.mrf.mxu1 }
 0x181   : > { %v4156_v52 = vpop.f32.mrf.mxu1 }
 0x183   : > { %v4170_v11 = vpop.f32.mrf.mxu1 }
 0x185   : > { %v4184_v59 = vpop.f32.mrf.mxu1 }
 0x187   : > { %v4198_v16 = vpop.f32.mrf.mxu1 }
 0x189   : > { %v4212_v62 = vpop.f32.mrf.mxu1 }
 0x18b   : > { %v4223_v0 = vpop.f32.mrf.mxu1 }
 0x18d   : > { %v4225_v21 = vpop.f32.mrf.mxu1 }
 0x18f   : > { %v4227_v3 = vpop.f32.mrf.mxu1 }
 0x191   : > { %v4229_v33 = vpop.f32.mrf.mxu1 }
 0x193   : > { %v4231_v34 = vpop.f32.mrf.mxu1 }
 0x195   : > { %v4233_v38 = vpop.f32.mrf.mxu1 }
 0x197   : > { %v4235_v44 = vpop.f32.mrf.mxu1 }
 0x199   : > { %v4237_v45 = vpop.f32.mrf.mxu1 }
 0x19b   : > { %v4239_v46 = vpop.f32.mrf.mxu1 }
 0x1ee   : > { %v1373_v49 = vpop.f32.mrf.mxu1 }
 0x1ef   : > { %v1374_v50 = vadd.f32 %v4244_v47, %v1373_v49 }
 0x1f0   : > { %v1375_v51 = vpop.f32.mrf.mxu1 }
 0x1f1   : > { %v1452_v9 = vmax.f32 %v1374_v50, 0.0 }
 0x1f2   : > { %v1378_v53 = vpop.f32.mrf.mxu1 }
 0x1f3   : > { %v1379_v55 = vadd.f32 %v4244_v47, %v1378_v53  ;;  %2968 = vmatmul.mubr.msk.f32.vlgmr.msra.gmra.mxu0 %vm1476_vm2, %v1452_v9 }
 0x1f4   : > { %v1380_v10 = vpop.f32.mrf.mxu1  ;;  %1595 = vmatprep.mubr.f32.mxu0 %v3417_v4  ;;  %1991 = vmatpush1.msra.mxu0 %v3981_v35 }
 0x1f5   : > { %v1453_v54 = vmax.f32 %v1379_v55, 0.0  ;;  %1992 = vmatprep.subr.mxu0 %v3986_v36 }
 0x1f6   : > { %v1383_v57 = vpop.f32.mrf.mxu1  ;;  %1993 = vmatpush1.msra.mxu0 %v3991_v37 }
 0x1f7   : > { %v1384_v12 = vadd.f32 %v4244_v47, %v1383_v57  ;;  %2969 = vmatmul.mubr.msk.f32.gmra.mxu0 %vm1476_vm2, %v1453_v54  ;;  %1994 = vmatprep.subr.mxu0 %v3997_v39 }
 0x1f8   : > { %v1385_v56 = vpop.f32.mrf.mxu1  ;;  %1601 = vmatprep.mubr.f32.mxu0 %v3417_v4  ;;  %1995 = vmatpush1.msra.mxu0 %v4003_v40 }
 0x1f9   : > { %v1454_v13 = vmax.f32 %v1384_v12, 0.0  ;;  %1996 = vmatprep.subr.mxu0 %v4009_v42 }
 0x1fa   : > { %v1388_v35 = vpop.f32.mrf.mxu1  ;;  %1997 = vmatpush1.msra.mxu0 %v4015_v43 }
 0x1fb   : > { %v1389_v36 = vadd.f32 %v4244_v47, %v1388_v35  ;;  %2970 = vmatmul.mubr.msk.f32.gmra.mxu0 %vm1476_vm2, %v1454_v13 }
 0x1fc   : > { %v1390_v37 = vpop.f32.mrf.mxu1  ;;  %1607 = vmatprep.mubr.f32.mxu0 %v3417_v4 }
 0x1fd   : > { %v1455_v14 = vmax.f32 %v1389_v36, 0.0 }
 0x1fe   : > { %v1393_v39 = vpop.f32.mrf.mxu1 }
 0x1ff   : > { %v1394_v58 = vadd.f32 %v4244_v47, %v1393_v39  ;;  %2971 = vmatmul.mubr.msk.f32.gmra.mxu0 %vm1476_vm2, %v1455_v14 }
 0x200   : > { %v1395_v40 = vpop.f32.mrf.mxu1  ;;  %1613 = vmatprep.mubr.f32.mxu0 %v3417_v4 }
 0x201   : > { %v1456_v42 = vmax.f32 %v1394_v58, 0.0 }
 0x202   : > { %v1398_v15 = vpop.f32.mrf.mxu1 }
 0x203   : > { %v1399_v43 = vadd.f32 %v4244_v47, %v1398_v15  ;;  %2972 = vmatmul.mubr.msk.f32.gmra.mxu0 %vm1476_vm2, %v1456_v42 }
 0x204   : > { %v1400_v61 = vpop.f32.mrf.mxu1  ;;  %1619 = vmatprep.mubr.f32.mxu0 %v3417_v4 }
 0x205   : > { %v1457_v60 = vmax.f32 %v1399_v43, 0.0 }
 0x206   : > { %v1403_v17 = vpop.f32.mrf.mxu1 }
 0x207   : > { %v1404_v63 = vadd.f32 %v4244_v47, %v1403_v17  ;;  %2973 = vmatmul.mubr.msk.f32.gmra.mxu0 %vm1476_vm2, %v1457_v60 }
 0x208   : > { %v1405_v18 = vpop.f32.mrf.mxu1  ;;  %1625 = vmatprep.mubr.f32.mxu0 %v3417_v4 }
 0x209   : > { %v1458_v19 = vmax.f32 %v1404_v63, 0.0 }
 0x20a   : > { %v1408_v1 = vpop.f32.mrf.mxu1 }
 0x20b   : > { %v1409_v20 = vadd.f32 %v4244_v47, %v1408_v1  ;;  %2974 = vmatmul.mubr.msk.f32.gmra.mxu0 %vm1476_vm2, %v1458_v19 }
 0x20c   : > { %v1410_v49 = vpop.f32.mrf.mxu1  ;;  %1631 = vmatprep.mubr.f32.mxu0 %v3417_v4 }
 0x20d   : > { %v1459_v50 = vmax.f32 %v1409_v20, 0.0 }
 0x20e   : > { %v1413_v51 = vpop.f32.mrf.mxu1 }
 0x20f   : > { %v1414_v9 = vadd.f32 %v4244_v47, %v1413_v51  ;;  %2975 = vmatmul.mubr.msk.f32.gmra.mxu0 %vm1476_vm2, %v1459_v50 }
 0x210   : > { %v1415_v53 = vpop.f32.mrf.mxu1  ;;  %1637 = vmatprep.mubr.f32.mxu0 %v3417_v4 }
 0x211   : > { %v1460_v55 = vmax.f32 %v1414_v9, 0.0  ;;  %v1734_v53 = vld [vmem:[%s4688_s8 + $0x80] sm:$0xff] }
 0x212   : > { %v1418_v10 = vpop.f32.mrf.mxu1  ;;  %3073 = vmatprep.subr.mxu1 %v1734_v53 }
 0x213   : > { %v1419_v54 = vadd.f32 %v4244_v47, %v1418_v10  ;;  %2976 = vmatmul.mubr.msk.f32.gmra.mxu0 %vm1476_vm2, %v1460_v55  ;;  %v1718_v55 = vld [vmem:[%s4688_s8] sm:$0xff] }
 0x214   : > { %v1420_v57 = vpop.f32.mrf.mxu1  ;;  %1643 = vmatprep.mubr.f32.mxu0 %v3417_v4  ;;  %3074 = vmatpush3.msra.mxu1 %v1718_v55 }
 0x215   : > { %v1461_v12 = vmax.f32 %v1419_v54, 0.0 }
 0x216   : > { %v1423_v56 = vpop.f32.mrf.mxu1 }
 0x217   : > { %v1424_v13 = vadd.f32 %v4244_v47, %v1423_v56  ;;  %2977 = vmatmul.mubr.msk.f32.gmra.mxu0 %vm1476_vm2, %v1461_v12 }
 0x218   : > { %v1425_v35 = vpop.f32.mrf.mxu1  ;;  %1649 = vmatprep.mubr.f32.mxu0 %v3417_v4 }
 0x219   : > { %v1462_v36 = vmax.f32 %v1424_v13, 0.0 }
 0x21a   : > { %v1428_v37 = vpop.f32.mrf.mxu1 }
 0x21b   : > { %v1429_v14 = vadd.f32 %v4244_v47, %v1428_v37  ;;  %2978 = vmatmul.mubr.msk.f32.gmra.mxu0 %vm1476_vm2, %v1462_v36 }
 0x21c   : > { %v1430_v39 = vpop.f32.mrf.mxu1  ;;  %1655 = vmatprep.mubr.f32.mxu0 %v3417_v4 }
 0x21d   : > { %v1463_v58 = vmax.f32 %v1429_v14, 0.0 }
 0x21e   : > { %v1433_v40 = vpop.f32.mrf.mxu1 }
 0x21f   : > { %v1434_v42 = vadd.f32 %v4244_v47, %v1433_v40  ;;  %2979 = vmatmul.mubr.msk.f32.gmra.mxu0 %vm1476_vm2, %v1463_v58 }
 0x220   : > { %v1435_v15 = vpop.f32.mrf.mxu1  ;;  %1661 = vmatprep.mubr.f32.mxu0 %v3417_v4 }
 0x221   : > { %v1464_v43 = vmax.f32 %v1434_v42, 0.0 }
 0x222   : > { %v1438_v61 = vpop.f32.mrf.mxu1 }
 0x223   : > { %v1439_v60 = vadd.f32 %v4244_v47, %v1438_v61  ;;  %2980 = vmatmul.mubr.msk.f32.gmra.mxu0 %vm1476_vm2, %v1464_v43 }
 0x224   : > { %v1440_v17 = vpop.f32.mrf.mxu1  ;;  %1667 = vmatprep.mubr.f32.mxu0 %v3417_v4 }
 0x225   : > { %v1465_v63 = vmax.f32 %v1439_v60, 0.0 }
 0x226   : > { %v1443_v18 = vpop.f32.mrf.mxu1 }
 0x227   : > { %v1444_v19 = vadd.f32 %v4244_v47, %v1443_v18  ;;  %2981 = vmatmul.mubr.msk.f32.gmra.mxu0 %vm1476_vm2, %v1465_v63 }
 0x228   : > { %v1445_v1 = vpop.f32.mrf.mxu1  ;;  %1673 = vmatprep.mubr.f32.mxu0 %v3417_v4 }
 0x229   : > { %v1466_v20 = vmax.f32 %v1444_v19, 0.0 }
 0x22a   : > { %v1448_v49 = vpop.f32.mrf.mxu1 }
 0x22b   : > { %v1449_v50 = vadd.f32 %v4244_v47, %v1448_v49  ;;  %2982 = vmatmul.mubr.msk.f32.gmra.mxu0 %vm1476_vm2, %v1466_v20 }
 0x22c   : > { %v1450_v51 = vpop.f32.mrf.mxu1  ;;  %1679 = vmatprep.mubr.f32.mxu0 %v3417_v4 }
 0x22d   : > { %v1467_v9 = vmax.f32 %v1449_v50, 0.0 }
 0x22f   : > { %2983 = vmatmul.mubr.msk.f32.gmra.mxu0 %vm1476_vm2, %v1467_v9 }
 0x230   : > { %2030 = vmatprep.mubr.f32.mxu0 %v3417_v4 }
 0x2b3   : > { %v1591_v47 = vpop.f32.mrf.mxu0 }
 0x2b4   : > { %v1686_v57 = vmul.f32 %v1591_v47, %v4087_v2 }
 0x2b5   : > { %v1593_v10 = vpop.f32.mrf.mxu0 }
 0x2b6   : > { %v1687_v54 = vmul.f32 %v1593_v10, %v4089_v22 }
 0x2b7   : > { %v1597_v12 = vpop.f32.mrf.mxu0 }
 0x2b8   : > { %1821 = vmatprep.mubr.f32.mxu1 %v1687_v54  ;;  %v1688_v35 = vmul.f32 %v1597_v12, %v4091_v23 }
 0x2b9   : > { %v1599_v56 = vpop.f32.mrf.mxu0  ;;  %1822 = vmatmul.mubr.f32.vlgmr.msra.gmra.mxu1 %v1686_v57 }
 0x2ba   : > { %v1689_v13 = vmul.f32 %v1599_v56, %v4093_v6 }
 0x2bb   : > { %v1603_v36 = vpop.f32.mrf.mxu0 }
 0x2bc   : > { %1826 = vmatprep.mubr.f32.mxu1 %v1689_v13  ;;  %v1690_v39 = vmul.f32 %v1603_v36, %v4095_v5 }
 0x2bd   : > { %v1605_v37 = vpop.f32.mrf.mxu0  ;;  %1827 = vmatmul.mubr.f32.gmra.mxu1 %v1688_v35 }
 0x2be   : > { %v1691_v14 = vmul.f32 %v1605_v37, %v4097_v24 }
 0x2bf   : > { %v1609_v58 = vpop.f32.mrf.mxu0 }
 0x2c0   : > { %1831 = vmatprep.mubr.f32.mxu1 %v1691_v14  ;;  %v1692_v15 = vmul.f32 %v1609_v58, %v4099_v25 }
 0x2c1   : > { %v1611_v40 = vpop.f32.mrf.mxu0  ;;  %1832 = vmatmul.mubr.f32.gmra.mxu1 %v1690_v39 }
 0x2c2   : > { %v1693_v42 = vmul.f32 %v1611_v40, %v4101_v8 }
 0x2c3   : > { %v1615_v43 = vpop.f32.mrf.mxu0 }
 0x2c4   : > { %1836 = vmatprep.mubr.f32.mxu1 %v1693_v42  ;;  %v1694_v17 = vmul.f32 %v1615_v43, %v4103_v7 }
 0x2c5   : > { %v1617_v61 = vpop.f32.mrf.mxu0  ;;  %1837 = vmatmul.mubr.f32.gmra.mxu1 %v1692_v15 }
 0x2c6   : > { %v1695_v60 = vmul.f32 %v1617_v61, %v4105_v26 }
 0x2c7   : > { %v1621_v63 = vpop.f32.mrf.mxu0 }
 0x2c8   : > { %1841 = vmatprep.mubr.f32.mxu1 %v1695_v60  ;;  %v1696_v1 = vmul.f32 %v1621_v63, %v4107_v27 }
 0x2c9   : > { %v1623_v18 = vpop.f32.mrf.mxu0  ;;  %1842 = vmatmul.mubr.f32.gmra.mxu1 %v1694_v17 }
 0x2ca   : > { %v1697_v19 = vmul.f32 %v1623_v18, %v4109_v28 }
 0x2cb   : > { %v1627_v20 = vpop.f32.mrf.mxu0 }
 0x2cc   : > { %1846 = vmatprep.mubr.f32.mxu1 %v1697_v19  ;;  %v1698_v51 = vmul.f32 %v1627_v20, %v4111_v29 }
 0x2cd   : > { %v1629_v49 = vpop.f32.mrf.mxu0  ;;  %1847 = vmatmul.mubr.f32.gmra.mxu1 %v1696_v1 }
 0x2ce   : > { %v1699_v50 = vmul.f32 %v1629_v49, %v4113_v30 }
 0x2cf   : > { %v1633_v9 = vpop.f32.mrf.mxu0 }
 0x2d0   : > { %1851 = vmatprep.mubr.f32.mxu1 %v1699_v50  ;;  %v1700_v47 = vmul.f32 %v1633_v9, %v4115_v31 }
 0x2d1   : > { %v1635_v53 = vpop.f32.mrf.mxu0  ;;  %1852 = vmatmul.mubr.f32.gmra.mxu1 %v1698_v51 }
 0x2d2   : > { %v1701_v55 = vmul.f32 %v1635_v53, %v4117_v32 }
 0x2d3   : > { %v1639_v10 = vpop.f32.mrf.mxu0 }
 0x2d4   : > { %1856 = vmatprep.mubr.f32.mxu1 %v1701_v55  ;;  %v1702_v12 = vmul.f32 %v1639_v10, %v4128_v41 }
 0x2d5   : > { %v1641_v54 = vpop.f32.mrf.mxu0  ;;  %1857 = vmatmul.mubr.f32.gmra.mxu1 %v1700_v47 }
 0x2d6   : > { %v1703_v57 = vmul.f32 %v1641_v54, %v4142_v48  ;;  %v2190_v54 = vld [vmem:[%s4690_s10 + $0xf8] sm:$0xff] }
 0x2d7   : > { %v1645_v56 = vpop.f32.mrf.mxu0  ;;  %3123 = vmatprep.subr.mxu1 %v2190_v54  ;;  %v4432_v54 = vld [vmem:[%s4689_s9] ss:$0 sm:$0xff] }
 0x2d8   : > { %1861 = vmatprep.mubr.f32.mxu1 %v1703_v57  ;;  %v1704_v36 = vmul.f32 %v1645_v56, %v4156_v52  ;;  %v2174_v57 = vld [vmem:[%s4690_s10 + $0x78] sm:$0xff]  ;;  %v2173_v56 = vld [vmem:[%s4690_s10 + $0x70] sm:$0xff] }
 0x2d9   : > { %v1647_v13 = vpop.f32.mrf.mxu0  ;;  %1862 = vmatmul.mubr.f32.gmra.mxu1 %v1702_v12  ;;  %v2189_v12 = vld [vmem:[%s4690_s10 + $0xf0] sm:$0xff] }
 0x2da   : > { %v1705_v35 = vmul.f32 %v1647_v13, %v4170_v11  ;;  %3124 = vmatpush3.msra.mxu1 %v2174_v57  ;;  %v2188_v13 = vld [vmem:[%s4690_s10 + $0xe8] sm:$0xff] }
 0x2db   : > { %v1651_v37 = vpop.f32.mrf.mxu0  ;;  %3125 = vmatprep.subr.mxu1 %v2189_v12 }
 0x2dc   : > { %1866 = vmatprep.mubr.f32.mxu1 %v1705_v35  ;;  %v1706_v58 = vmul.f32 %v1651_v37, %v4184_v59  ;;  %v2172_v35 = vld [vmem:[%s4690_s10 + $0x68] sm:$0xff]  ;;  %3126 = vmatpush3.msra.mxu1 %v2173_v56  ;;  %v2171_v37 = vld [vmem:[%s4690_s10 + $0x60] sm:$0xff] }
 0x2dd   : > { %v1653_v14 = vpop.f32.mrf.mxu0  ;;  %1867 = vmatmul.mubr.f32.gmra.mxu1 %v1704_v36  ;;  %v2187_v36 = vld [vmem:[%s4690_s10 + $0xe0] sm:$0xff]  ;;  %3127 = vmatprep.subr.mxu1 %v2188_v13 }
 0x2de   : > { %v1707_v39 = vmul.f32 %v1653_v14, %v4198_v16  ;;  %3128 = vmatpush3.msra.mxu1 %v2172_v35  ;;  %v2186_v14 = vld [vmem:[%s4690_s10 + $0xd8] sm:$0xff] }
 0x2df   : > { %v1657_v40 = vpop.f32.mrf.mxu0  ;;  %3129 = vmatprep.subr.mxu1 %v2187_v36 }
 0x2e0   : > { %1871 = vmatprep.mubr.f32.mxu1 %v1707_v39  ;;  %v1708_v43 = vmul.f32 %v1657_v40, %v4212_v62  ;;  %v2170_v39 = vld [vmem:[%s4690_s10 + $0x58] sm:$0xff]  ;;  %3130 = vmatpush3.msra.mxu1 %v2171_v37  ;;  %v2169_v40 = vld [vmem:[%s4690_s10 + $0x50] sm:$0xff] }
 0x2e1   : > { %v1659_v42 = vpop.f32.mrf.mxu0  ;;  %1872 = vmatmul.mubr.f32.gmra.mxu1 %v1706_v58  ;;  %v2185_v58 = vld [vmem:[%s4690_s10 + $0xd0] sm:$0xff]  ;;  %3131 = vmatprep.subr.mxu1 %v2186_v14 }
 0x2e2   : > { %v1709_v15 = vmul.f32 %v1659_v42, %v4223_v0  ;;  %3132 = vmatpush3.msra.mxu1 %v2170_v39  ;;  %v2184_v42 = vld [vmem:[%s4690_s10 + $0xc8] sm:$0xff] }
 0x2e3   : > { %v1663_v61 = vpop.f32.mrf.mxu0  ;;  %3133 = vmatprep.subr.mxu1 %v2185_v58 }
 0x2e4   : > { %1876 = vmatprep.mubr.f32.mxu1 %v1709_v15  ;;  %v1710_v63 = vmul.f32 %v1663_v61, %v4225_v21  ;;  %v2168_v15 = vld [vmem:[%s4690_s10 + $0x48] sm:$0xff]  ;;  %3134 = vmatpush3.msra.mxu1 %v2169_v40  ;;  %v2167_v61 = vld [vmem:[%s4690_s10 + $0x40] sm:$0xff] }
 0x2e5   : > { %v1665_v60 = vpop.f32.mrf.mxu0  ;;  %1877 = vmatmul.mubr.f32.gmra.mxu1 %v1708_v43  ;;  %v2183_v43 = vld [vmem:[%s4690_s10 + $0xc0] sm:$0xff]  ;;  %3135 = vmatprep.subr.mxu1 %v2184_v42 }
 0x2e6   : > { %v1711_v17 = vmul.f32 %v1665_v60, %v4227_v3  ;;  %3136 = vmatpush3.msra.mxu1 %v2168_v15  ;;  %v2182_v60 = vld [vmem:[%s4690_s10 + $0xb8] sm:$0xff] }
 0x2e7   : > { %v1669_v18 = vpop.f32.mrf.mxu0  ;;  %3137 = vmatprep.subr.mxu1 %v2183_v43 }
 0x2e8   : > { %1881 = vmatprep.mubr.f32.mxu1 %v1711_v17  ;;  %v1712_v20 = vmul.f32 %v1669_v18, %v4229_v33  ;;  %v2166_v17 = vld [vmem:[%s4690_s10 + $0x38] sm:$0xff]  ;;  %3138 = vmatpush3.msra.mxu1 %v2167_v61  ;;  %v2165_v18 = vld [vmem:[%s4690_s10 + $0x30] sm:$0xff] }
 0x2e9   : > { %v1671_v19 = vpop.f32.mrf.mxu0  ;;  %1882 = vmatmul.mubr.f32.gmra.mxu1 %v1710_v63  ;;  %v2181_v63 = vld [vmem:[%s4690_s10 + $0xb0] sm:$0xff]  ;;  %3139 = vmatprep.subr.mxu1 %v2182_v60 }
 0x2ea   : > { %v1713_v1 = vmul.f32 %v1671_v19, %v4231_v34  ;;  %3140 = vmatpush3.msra.mxu1 %v2166_v17  ;;  %v2180_v19 = vld [vmem:[%s4690_s10 + $0xa8] sm:$0xff] }
 0x2eb   : > { %v1675_v49 = vpop.f32.mrf.mxu0  ;;  %3141 = vmatprep.subr.mxu1 %v2181_v63 }
 0x2ec   : > { %1886 = vmatprep.mubr.f32.mxu1 %v1713_v1  ;;  %v1714_v9 = vmul.f32 %v1675_v49, %v4233_v38  ;;  %v2164_v1 = vld [vmem:[%s4690_s10 + $0x28] sm:$0xff]  ;;  %3142 = vmatpush3.msra.mxu1 %v2165_v18  ;;  %v2163_v49 = vld [vmem:[%s4690_s10 + $0x20] sm:$0xff] }
 0x2ed   : > { %v1677_v50 = vpop.f32.mrf.mxu0  ;;  %1887 = vmatmul.mubr.f32.gmra.mxu1 %v1712_v20  ;;  %v2179_v20 = vld [vmem:[%s4690_s10 + $0xa0] sm:$0xff]  ;;  %3143 = vmatprep.subr.mxu1 %v2180_v19 }
 0x2ee   : > { %v1715_v51 = vmul.f32 %v1677_v50, %v4235_v44  ;;  %3144 = vmatpush3.msra.mxu1 %v2164_v1  ;;  %v2178_v50 = vld [vmem:[%s4690_s10 + $0x98] sm:$0xff] }
 0x2ef   : > { %v1681_v53 = vpop.f32.mrf.mxu0  ;;  %3145 = vmatprep.subr.mxu1 %v2179_v20 }
 0x2f0   : > { %1891 = vmatprep.mubr.f32.mxu1 %v1715_v51  ;;  %v1716_v10 = vmul.f32 %v1681_v53, %v4237_v45  ;;  %v2162_v51 = vld [vmem:[%s4690_s10 + $0x18] sm:$0xff]  ;;  %3146 = vmatpush3.msra.mxu1 %v2163_v49  ;;  %v2161_v53 = vld [vmem:[%s4690_s10 + $0x10] sm:$0xff] }
 0x2f1   : > { %v1683_v55 = vpop.f32.mrf.mxu0  ;;  %1892 = vmatmul.mubr.f32.gmra.mxu1 %v1714_v9  ;;  %v2177_v9 = vld [vmem:[%s4690_s10 + $0x90] sm:$0xff]  ;;  %3147 = vmatprep.subr.mxu1 %v2178_v50 }
 0x2f2   : > { %v1717_v47 = vmul.f32 %v1683_v55, %v4239_v46  ;;  %3148 = vmatpush3.msra.mxu1 %v2162_v51  ;;  %v2176_v55 = vld [vmem:[%s4690_s10 + $0x88] sm:$0xff] }
 0x2f3   : > { %3149 = vmatprep.subr.mxu1 %v2177_v9 }
 0x2f4   : > { %1896 = vmatprep.mubr.f32.mxu1 %v1717_v47  ;;  %v2160_v47 = vld [vmem:[%s4690_s10 + $0x8] sm:$0xff]  ;;  %3150 = vmatpush3.msra.mxu1 %v2161_v53 }
 0x2f5   : > { %1897 = vmatmul.mubr.f32.gmra.mxu1 %v1716_v10  ;;  %3151 = vmatprep.subr.mxu1 %v2176_v55 }
 0x2f6   : > { %3152 = vmatpush3.msra.mxu1 %v2160_v47 }
 0x379   : > { %v3075_v10 = vpop.f32.mrf.mxu1 }
 0x37b   : > { %v3076_v57 = vpop.f32.mrf.mxu1 }
 0x37c   : > { %v3077_v12 = vadd.f32 %v3076_v57, %v3075_v10 }
 0x37d   : > { %v3078_v56 = vpop.f32.mrf.mxu1 }
 0x37e   : > { %v1824_v13 = vadd.f32 %v3077_v12, %v4432_v54 }
 0x37f   : > { %v3079_v35 = vpop.f32.mrf.mxu1 }
 0x380   : > { %v1902_v36 = vmax.f32 %v1824_v13, 0.0  ;;  %v3080_v37 = vadd.f32 %v3079_v35, %v3078_v56 }
 0x381   : > { %v3081_v14 = vpop.f32.mrf.mxu1 }
 0x382   : > { %v1829_v39 = vadd.f32 %v3080_v37, %v4432_v54  ;;  %2985 = vmatmul.mubr.msk.f32.vlgmr.msra.gmra.mxu0 %vm1476_vm2, %v1902_v36 }
 0x383   : > { %v3082_v58 = vpop.f32.mrf.mxu1  ;;  %2036 = vmatprep.mubr.f32.mxu0 %v3417_v4 }
 0x384   : > { %v1903_v40 = vmax.f32 %v1829_v39, 0.0  ;;  %v3083_v42 = vadd.f32 %v3082_v58, %v3081_v14 }
 0x385   : > { %v3084_v15 = vpop.f32.mrf.mxu1 }
 0x386   : > { %v1834_v43 = vadd.f32 %v3083_v42, %v4432_v54  ;;  %2986 = vmatmul.mubr.msk.f32.gmra.mxu0 %vm1476_vm2, %v1903_v40 }
 0x387   : > { %v3085_v61 = vpop.f32.mrf.mxu1  ;;  %2042 = vmatprep.mubr.f32.mxu0 %v3417_v4 }
 0x388   : > { %v1904_v60 = vmax.f32 %v1834_v43, 0.0  ;;  %v3086_v17 = vadd.f32 %v3085_v61, %v3084_v15 }
 0x389   : > { %v3087_v63 = vpop.f32.mrf.mxu1 }
 0x38a   : > { %v1839_v18 = vadd.f32 %v3086_v17, %v4432_v54  ;;  %2987 = vmatmul.mubr.msk.f32.gmra.mxu0 %vm1476_vm2, %v1904_v60 }
 0x38b   : > { %v3088_v19 = vpop.f32.mrf.mxu1  ;;  %2048 = vmatprep.mubr.f32.mxu0 %v3417_v4 }
 0x38c   : > { %v1905_v1 = vmax.f32 %v1839_v18, 0.0  ;;  %v3089_v20 = vadd.f32 %v3088_v19, %v3087_v63 }
 0x38d   : > { %v3090_v49 = vpop.f32.mrf.mxu1 }
 0x38e   : > { %v1844_v50 = vadd.f32 %v3089_v20, %v4432_v54  ;;  %2988 = vmatmul.mubr.msk.f32.gmra.mxu0 %vm1476_vm2, %v1905_v1 }
 0x38f   : > { %v3091_v51 = vpop.f32.mrf.mxu1  ;;  %2054 = vmatprep.mubr.f32.mxu0 %v3417_v4 }
 0x390   : > { %v1906_v9 = vmax.f32 %v1844_v50, 0.0  ;;  %v3092_v53 = vadd.f32 %v3091_v51, %v3090_v49 }
 0x391   : > { %v3093_v55 = vpop.f32.mrf.mxu1 }
 0x392   : > { %v1849_v47 = vadd.f32 %v3092_v53, %v4432_v54  ;;  %2989 = vmatmul.mubr.msk.f32.gmra.mxu0 %vm1476_vm2, %v1906_v9 }
 0x393   : > { %v3094_v10 = vpop.f32.mrf.mxu1  ;;  %2060 = vmatprep.mubr.f32.mxu0 %v3417_v4 }
 0x394   : > { %v1907_v57 = vmax.f32 %v1849_v47, 0.0  ;;  %v3095_v12 = vadd.f32 %v3094_v10, %v3093_v55 }
 0x395   : > { %v3096_v56 = vpop.f32.mrf.mxu1 }
 0x396   : > { %v1854_v13 = vadd.f32 %v3095_v12, %v4432_v54  ;;  %2990 = vmatmul.mubr.msk.f32.gmra.mxu0 %vm1476_vm2, %v1907_v57 }
 0x397   : > { %v3097_v35 = vpop.f32.mrf.mxu1  ;;  %2066 = vmatprep.mubr.f32.mxu0 %v3417_v4 }
 0x398   : > { %v1908_v36 = vmax.f32 %v1854_v13, 0.0  ;;  %v3098_v37 = vadd.f32 %v3097_v35, %v3096_v56 }
 0x399   : > { %v3099_v14 = vpop.f32.mrf.mxu1 }
 0x39a   : > { %v1859_v39 = vadd.f32 %v3098_v37, %v4432_v54  ;;  %2991 = vmatmul.mubr.msk.f32.gmra.mxu0 %vm1476_vm2, %v1908_v36 }
 0x39b   : > { %v3100_v58 = vpop.f32.mrf.mxu1  ;;  %2072 = vmatprep.mubr.f32.mxu0 %v3417_v4 }
 0x39c   : > { %v1909_v40 = vmax.f32 %v1859_v39, 0.0  ;;  %v3101_v42 = vadd.f32 %v3100_v58, %v3099_v14 }
 0x39d   : > { %v3102_v15 = vpop.f32.mrf.mxu1 }
 0x39e   : > { %v1864_v43 = vadd.f32 %v3101_v42, %v4432_v54  ;;  %2992 = vmatmul.mubr.msk.f32.gmra.mxu0 %vm1476_vm2, %v1909_v40 }
 0x39f   : > { %v3103_v61 = vpop.f32.mrf.mxu1  ;;  %2078 = vmatprep.mubr.f32.mxu0 %v3417_v4 }
 0x3a0   : > { %v1910_v60 = vmax.f32 %v1864_v43, 0.0  ;;  %v3104_v17 = vadd.f32 %v3103_v61, %v3102_v15 }
 0x3a1   : > { %v3105_v63 = vpop.f32.mrf.mxu1 }
 0x3a2   : > { %v1869_v18 = vadd.f32 %v3104_v17, %v4432_v54  ;;  %2993 = vmatmul.mubr.msk.f32.gmra.mxu0 %vm1476_vm2, %v1910_v60 }
 0x3a3   : > { %v3106_v19 = vpop.f32.mrf.mxu1  ;;  %2084 = vmatprep.mubr.f32.mxu0 %v3417_v4 }
 0x3a4   : > { %v1911_v1 = vmax.f32 %v1869_v18, 0.0  ;;  %v3107_v20 = vadd.f32 %v3106_v19, %v3105_v63  ;;  %v2175_v19 = vld [vmem:[%s4690_s10 + $0x80] sm:$0xff] }
 0x3a5   : > { %v3108_v49 = vpop.f32.mrf.mxu1  ;;  %3153 = vmatprep.subr.mxu1 %v2175_v19 }
 0x3a6   : > { %v1874_v50 = vadd.f32 %v3107_v20, %v4432_v54  ;;  %2994 = vmatmul.mubr.msk.f32.gmra.mxu0 %vm1476_vm2, %v1911_v1  ;;  %v2159_v1 = vld [vmem:[%s4690_s10] sm:$0xff] }
 0x3a7   : > { %v3109_v51 = vpop.f32.mrf.mxu1  ;;  %2090 = vmatprep.mubr.f32.mxu0 %v3417_v4  ;;  %3154 = vmatpush3.msra.mxu1 %v2159_v1 }
 0x3a8   : > { %v1912_v9 = vmax.f32 %v1874_v50, 0.0  ;;  %v3110_v53 = vadd.f32 %v3109_v51, %v3108_v49 }
 0x3a9   : > { %v3111_v55 = vpop.f32.mrf.mxu1 }
 0x3aa   : > { %v1879_v47 = vadd.f32 %v3110_v53, %v4432_v54  ;;  %2995 = vmatmul.mubr.msk.f32.gmra.mxu0 %vm1476_vm2, %v1912_v9 }
 0x3ab   : > { %v3112_v10 = vpop.f32.mrf.mxu1  ;;  %2096 = vmatprep.mubr.f32.mxu0 %v3417_v4 }
 0x3ac   : > { %v1913_v57 = vmax.f32 %v1879_v47, 0.0  ;;  %v3113_v12 = vadd.f32 %v3112_v10, %v3111_v55 }
 0x3ad   : > { %v3114_v56 = vpop.f32.mrf.mxu1 }
 0x3ae   : > { %v1884_v13 = vadd.f32 %v3113_v12, %v4432_v54  ;;  %2996 = vmatmul.mubr.msk.f32.gmra.mxu0 %vm1476_vm2, %v1913_v57 }
 0x3af   : > { %v3115_v35 = vpop.f32.mrf.mxu1  ;;  %2102 = vmatprep.mubr.f32.mxu0 %v3417_v4 }
 0x3b0   : > { %v1914_v36 = vmax.f32 %v1884_v13, 0.0  ;;  %v3116_v37 = vadd.f32 %v3115_v35, %v3114_v56 }
 0x3b1   : > { %v3117_v14 = vpop.f32.mrf.mxu1 }
 0x3b2   : > { %v1889_v39 = vadd.f32 %v3116_v37, %v4432_v54  ;;  %2997 = vmatmul.mubr.msk.f32.gmra.mxu0 %vm1476_vm2, %v1914_v36 }
 0x3b3   : > { %v3118_v58 = vpop.f32.mrf.mxu1  ;;  %2108 = vmatprep.mubr.f32.mxu0 %v3417_v4 }
 0x3b4   : > { %v1915_v40 = vmax.f32 %v1889_v39, 0.0  ;;  %v3119_v42 = vadd.f32 %v3118_v58, %v3117_v14 }
 0x3b5   : > { %v3120_v15 = vpop.f32.mrf.mxu1 }
 0x3b6   : > { %v1894_v43 = vadd.f32 %v3119_v42, %v4432_v54  ;;  %2998 = vmatmul.mubr.msk.f32.gmra.mxu0 %vm1476_vm2, %v1915_v40 }
 0x3b7   : > { %v3121_v61 = vpop.f32.mrf.mxu1  ;;  %2114 = vmatprep.mubr.f32.mxu0 %v3417_v4 }
 0x3b8   : > { %v1916_v60 = vmax.f32 %v1894_v43, 0.0  ;;  %v3122_v17 = vadd.f32 %v3121_v61, %v3120_v15 }
 0x3ba   : > { %v1899_v63 = vadd.f32 %v3122_v17, %v4432_v54  ;;  %2999 = vmatmul.mubr.msk.f32.gmra.mxu0 %vm1476_vm2, %v1916_v60  ;;  %v2361_v54 = vld [vmem:[%s4692_s12 + $0x10] sm:$0xff] }
 0x3bb   : > { %2120 = vmatprep.mubr.f32.mxu0 %v3417_v4  ;;  %v2360_v4 = vld [vmem:[%s4692_s12 + $0x8] sm:$0xff]  ;;  %3245 = vmatprep.subr.mxu0 %v2361_v54 }
 0x3bc   : > { %v1917_v18 = vmax.f32 %v1899_v63, 0.0  ;;  %3246 = vmatpush3.msra.mxu0 %v2361_v54 }
 0x3bd   : > { %3247 = vmatprep.subr.mxu0 %v2360_v4 }
 0x3be   : > { %3000 = vmatmul.mubr.msk.f32.gmra.mxu0 %vm1476_vm2, %v1917_v18 }
 0x3bf   : > { %3248 = vmatpush3.msra.mxu0 %v2360_v4 }
 0x442   : > { %v2032_v20 = vpop.f32.mrf.mxu0 }
 0x443   : > { %v2127_v51 = vmul.f32 %v2032_v20, %v4087_v2 }
 0x444   : > { %v2034_v49 = vpop.f32.mrf.mxu0 }
 0x445   : > { %v2128_v50 = vmul.f32 %v2034_v49, %v4089_v22 }
 0x446   : > { %v2038_v9 = vpop.f32.mrf.mxu0 }
 0x447   : > { %2262 = vmatprep.mubr.f32.mxu1 %v2128_v50  ;;  %v2129_v47 = vmul.f32 %v2038_v9, %v4091_v23 }
 0x448   : > { %v2040_v53 = vpop.f32.mrf.mxu0  ;;  %2263 = vmatmul.mubr.f32.vlgmr.msra.gmra.mxu1 %v2127_v51 }
 0x449   : > { %v2130_v55 = vmul.f32 %v2040_v53, %v4093_v6 }
 0x44a   : > { %v2044_v10 = vpop.f32.mrf.mxu0 }
 0x44b   : > { %2267 = vmatprep.mubr.f32.mxu1 %v2130_v55  ;;  %v2131_v56 = vmul.f32 %v2044_v10, %v4095_v5 }
 0x44c   : > { %v2046_v57 = vpop.f32.mrf.mxu0  ;;  %2268 = vmatmul.mubr.f32.gmra.mxu1 %v2129_v47 }
 0x44d   : > { %v2132_v12 = vmul.f32 %v2046_v57, %v4097_v24 }
 0x44e   : > { %v2050_v13 = vpop.f32.mrf.mxu0 }
 0x44f   : > { %2272 = vmatprep.mubr.f32.mxu1 %v2132_v12  ;;  %v2133_v35 = vmul.f32 %v2050_v13, %v4099_v25 }
 0x450   : > { %v2052_v22 = vpop.f32.mrf.mxu0  ;;  %2273 = vmatmul.mubr.f32.gmra.mxu1 %v2131_v56 }
 0x451   : > { %v2134_v2 = vmul.f32 %v2052_v22, %v4101_v8 }
 0x452   : > { %v2056_v36 = vpop.f32.mrf.mxu0 }
 0x453   : > { %2277 = vmatprep.mubr.f32.mxu1 %v2134_v2  ;;  %v2135_v37 = vmul.f32 %v2056_v36, %v4103_v7 }
 0x454   : > { %v2058_v6 = vpop.f32.mrf.mxu0  ;;  %2278 = vmatmul.mubr.f32.gmra.mxu1 %v2133_v35 }
 0x455   : > { %v2136_v23 = vmul.f32 %v2058_v6, %v4105_v26 }
 0x456   : > { %v2062_v14 = vpop.f32.mrf.mxu0 }
 0x457   : > { %2282 = vmatprep.mubr.f32.mxu1 %v2136_v23  ;;  %v2137_v39 = vmul.f32 %v2062_v14, %v4107_v27 }
 0x458   : > { %v2064_v24 = vpop.f32.mrf.mxu0  ;;  %2283 = vmatmul.mubr.f32.gmra.mxu1 %v2135_v37 }
 0x459   : > { %v2138_v5 = vmul.f32 %v2064_v24, %v4109_v28 }
 0x45a   : > { %v2068_v58 = vpop.f32.mrf.mxu0 }
 0x45b   : > { %2287 = vmatprep.mubr.f32.mxu1 %v2138_v5  ;;  %v2139_v40 = vmul.f32 %v2068_v58, %v4111_v29 }
 0x45c   : > { %v2070_v8 = vpop.f32.mrf.mxu0  ;;  %2288 = vmatmul.mubr.f32.gmra.mxu1 %v2137_v39 }
 0x45d   : > { %v2140_v25 = vmul.f32 %v2070_v8, %v4113_v30 }
 0x45e   : > { %v2074_v42 = vpop.f32.mrf.mxu0 }
 0x45f   : > { %2292 = vmatprep.mubr.f32.mxu1 %v2140_v25  ;;  %v2141_v15 = vmul.f32 %v2074_v42, %v4115_v31 }
 0x460   : > { %v2076_v26 = vpop.f32.mrf.mxu0  ;;  %2293 = vmatmul.mubr.f32.gmra.mxu1 %v2139_v40 }
 0x461   : > { %v2142_v7 = vmul.f32 %v2076_v26, %v4117_v32 }
 0x462   : > { %v2080_v43 = vpop.f32.mrf.mxu0 }
 0x463   : > { %2297 = vmatprep.mubr.f32.mxu1 %v2142_v7  ;;  %v2143_v61 = vmul.f32 %v2080_v43, %v4128_v41 }
 0x464   : > { %v2082_v28 = vpop.f32.mrf.mxu0  ;;  %2298 = vmatmul.mubr.f32.gmra.mxu1 %v2141_v15 }
 0x465   : > { %v2144_v27 = vmul.f32 %v2082_v28, %v4142_v48 }
 0x466   : > { %v2086_v60 = vpop.f32.mrf.mxu0 }
 0x467   : > { %2302 = vmatprep.mubr.f32.mxu1 %v2144_v27  ;;  %v2145_v17 = vmul.f32 %v2086_v60, %v4156_v52 }
 0x468   : > { %v2088_v30 = vpop.f32.mrf.mxu0  ;;  %2303 = vmatmul.mubr.f32.gmra.mxu1 %v2143_v61 }
 0x469   : > { %v2146_v29 = vmul.f32 %v2088_v30, %v4170_v11 }
 0x46a   : > { %v2092_v63 = vpop.f32.mrf.mxu0 }
 0x46b   : > { %2307 = vmatprep.mubr.f32.mxu1 %v2146_v29  ;;  %v2147_v18 = vmul.f32 %v2092_v63, %v4184_v59 }
 0x46c   : > { %v2094_v32 = vpop.f32.mrf.mxu0  ;;  %2308 = vmatmul.mubr.f32.gmra.mxu1 %v2145_v17 }
 0x46d   : > { %v2148_v31 = vmul.f32 %v2094_v32, %v4198_v16 }
 0x46e   : > { %v2098_v19 = vpop.f32.mrf.mxu0 }
 0x46f   : > { %2312 = vmatprep.mubr.f32.mxu1 %v2148_v31  ;;  %v2149_v1 = vmul.f32 %v2098_v19, %v4212_v62 }
 0x470   : > { %v2100_v48 = vpop.f32.mrf.mxu0  ;;  %2313 = vmatmul.mubr.f32.gmra.mxu1 %v2147_v18 }
 0x471   : > { %v2150_v41 = vmul.f32 %v2100_v48, %v4223_v0 }
 0x472   : > { %v2104_v54 = vpop.f32.mrf.mxu0 }
 0x473   : > { %2317 = vmatprep.mubr.f32.mxu1 %v2150_v41  ;;  %v2151_v4 = vmul.f32 %v2104_v54, %v4225_v21 }
 0x474   : > { %v2106_v11 = vpop.f32.mrf.mxu0  ;;  %2318 = vmatmul.mubr.f32.gmra.mxu1 %v2149_v1 }
 0x475   : > { %v2152_v52 = vmul.f32 %v2106_v11, %v4227_v3 }
 0x476   : > { %v2110_v20 = vpop.f32.mrf.mxu0 }
 0x477   : > { %2322 = vmatprep.mubr.f32.mxu1 %v2152_v52  ;;  %v2153_v49 = vmul.f32 %v2110_v20, %v4229_v33  ;;  %v2359_v33 = vld [vmem:[%s4692_s12] sm:$0xff] }
 0x478   : > { %v2112_v16 = vpop.f32.mrf.mxu0  ;;  %2323 = vmatmul.mubr.f32.gmra.mxu1 %v2151_v4  ;;  %3249 = vmatprep.subr.mxu0 %v2359_v33 }
 0x479   : > { %v2154_v59 = vmul.f32 %v2112_v16, %v4231_v34  ;;  %3250 = vmatpush3.msra.mxu0 %v2359_v33  ;;  %v2584_v34 = vld [vmem:[%s4694_s14 + $0x30] sm:$0x3f] }
 0x47a   : > { %v2116_v50 = vpop.f32.mrf.mxu0  ;;  %3275 = vmatprep.subr.msk.mxu1 %vm2641_vm3, %v2584_v34 }
 0x47b   : > { %2327 = vmatprep.mubr.f32.mxu1 %v2154_v59  ;;  %v2155_v51 = vmul.f32 %v2116_v50, %v4233_v38  ;;  %v2583_v38 = vld [vmem:[%s4694_s14 + $0x28] sm:$0xff]  ;;  %3276 = vmatpush3.msk.msra.mxu1 %vm2641_vm3, %v2584_v34 }
 0x47c   : > { %v2118_v0 = vpop.f32.mrf.mxu0  ;;  %2328 = vmatmul.mubr.f32.gmra.mxu1 %v2153_v49  ;;  %3277 = vmatprep.subr.mxu1 %v2583_v38 }
 0x47d   : > { %v2156_v62 = vmul.f32 %v2118_v0, %v4235_v44  ;;  %v2582_v44 = vld [vmem:[%s4694_s14 + $0x20] sm:$0xff]  ;;  %3278 = vmatpush3.msra.mxu1 %v2583_v38 }
 0x47e   : > { %v2122_v9 = vpop.f32.mrf.mxu0  ;;  %3279 = vmatprep.subr.mxu1 %v2582_v44 }
 0x47f   : > { %2332 = vmatprep.mubr.f32.mxu1 %v2156_v62  ;;  %v2157_v53 = vmul.f32 %v2122_v9, %v4237_v45  ;;  %3280 = vmatpush3.msra.mxu1 %v2582_v44 }
 0x480   : > { %v2124_v3 = vpop.f32.mrf.mxu0  ;;  %2333 = vmatmul.mubr.f32.gmra.mxu1 %v2155_v51 }
 0x481   : > { %v2158_v21 = vmul.f32 %v2124_v3, %v4239_v46  ;;  %v4540_v46 = vld [vmem:[%s4691_s11] ss:$0 sm:$0xff] }
 0x483   : > { %2337 = vmatprep.mubr.f32.mxu1 %v2158_v21 }
 0x484   : > { %2338 = vmatmul.mubr.f32.gmra.mxu1 %v2157_v53 }
 0x508   : > { %v3155_v45 = vpop.f32.mrf.mxu1 }
 0x50a   : > { %v3156_v55 = vpop.f32.mrf.mxu1 }
 0x50b   : > { %v3157_v47 = vadd.f32 %v3156_v55, %v3155_v45 }
 0x50c   : > { %v3158_v10 = vpop.f32.mrf.mxu1 }
 0x50d   : > { %v2265_v57 = vadd.f32 %v3157_v47, %v4540_v46 }
 0x50e   : > { %v3159_v12 = vpop.f32.mrf.mxu1 }
 0x50f   : > { %v2343_v56 = vmax.f32 %v2265_v57, 0.0  ;;  %v3160_v13 = vadd.f32 %v3159_v12, %v3158_v10 }
 0x510   : > { %v3161_v22 = vpop.f32.mrf.mxu1 }
 0x511   : > { %v2270_v2 = vadd.f32 %v3160_v13, %v4540_v46  ;;  %3251 = vmatprep.mubr.msk.f32.mxu0 %vm986_vm1, %v2343_v56 }
 0x512   : > { %v3162_v35 = vpop.f32.mrf.mxu1 }
 0x513   : > { %v2344_v36 = vmax.f32 %v2270_v2, 0.0  ;;  %v3163_v6 = vadd.f32 %v3162_v35, %v3161_v22 }
 0x514   : > { %v3164_v23 = vpop.f32.mrf.mxu1 }
 0x515   : > { %v2275_v37 = vadd.f32 %v3163_v6, %v4540_v46  ;;  %3252 = vmatmul.mubr.msk.f32.vlgmr.msra.gmra.mxu0 %vm986_vm1, %v2344_v36 }
 0x516   : > { %v3165_v14 = vpop.f32.mrf.mxu1 }
 0x517   : > { %v2345_v24 = vmax.f32 %v2275_v37, 0.0  ;;  %v3166_v5 = vadd.f32 %v3165_v14, %v3164_v23 }
 0x518   : > { %v3167_v39 = vpop.f32.mrf.mxu1 }
 0x519   : > { %v2280_v58 = vadd.f32 %v3166_v5, %v4540_v46  ;;  %3254 = vmatprep.mubr.msk.f32.mxu0 %vm986_vm1, %v2345_v24  ;;  %v2581_v5 = vld [vmem:[%s4694_s14 + $0x18] sm:$0xff] }
 0x51a   : > { %v3168_v8 = vpop.f32.mrf.mxu1  ;;  %3281 = vmatprep.subr.mxu1 %v2581_v5 }
 0x51b   : > { %v2346_v25 = vmax.f32 %v2280_v58, 0.0  ;;  %v3169_v40 = vadd.f32 %v3168_v8, %v3167_v39  ;;  %3282 = vmatpush3.msra.mxu1 %v2581_v5  ;;  %v2580_v39 = vld [vmem:[%s4694_s14 + $0x10] sm:$0xff]  ;;  %v2578_v58 = vld [vmem:[%s4694_s14] sm:$0xff] }
 0x51c   : > { %v3170_v42 = vpop.f32.mrf.mxu1  ;;  %3283 = vmatprep.subr.mxu1 %v2580_v39  ;;  %v3002_v8 = vld [vmem:[%s4693_s13] ss:$0 sm:$0xff] }
 0x51d   : > { %v2285_v26 = vadd.f32 %v3169_v40, %v4540_v46  ;;  %3255 = vmatmul.mubr.msk.f32.gmra.mxu0 %vm986_vm1, %v2346_v25  ;;  %3284 = vmatpush3.msra.mxu1 %v2580_v39 }
 0x51e   : > { %v3171_v7 = vpop.f32.mrf.mxu1 }
 0x51f   : > { %v2347_v15 = vmax.f32 %v2285_v26, 0.0  ;;  %v3172_v43 = vadd.f32 %v3171_v7, %v3170_v42 }
 0x520   : > { %v3173_v28 = vpop.f32.mrf.mxu1 }
 0x521   : > { %v2290_v27 = vadd.f32 %v3172_v43, %v4540_v46  ;;  %3257 = vmatprep.mubr.msk.f32.mxu0 %vm986_vm1, %v2347_v15 }
 0x522   : > { %v3174_v61 = vpop.f32.mrf.mxu1 }
 0x523   : > { %v2348_v60 = vmax.f32 %v2290_v27, 0.0  ;;  %v3175_v30 = vadd.f32 %v3174_v61, %v3173_v28 }
 0x524   : > { %v3176_v29 = vpop.f32.mrf.mxu1 }
 0x525   : > { %v2295_v17 = vadd.f32 %v3175_v30, %v4540_v46  ;;  %3258 = vmatmul.mubr.msk.f32.gmra.mxu0 %vm986_vm1, %v2348_v60 }
 0x526   : > { %v3177_v63 = vpop.f32.mrf.mxu1 }
 0x527   : > { %v2349_v32 = vmax.f32 %v2295_v17, 0.0  ;;  %v3178_v31 = vadd.f32 %v3177_v63, %v3176_v29 }
 0x528   : > { %v3179_v18 = vpop.f32.mrf.mxu1 }
 0x529   : > { %v2300_v19 = vadd.f32 %v3178_v31, %v4540_v46  ;;  %3260 = vmatprep.mubr.msk.f32.mxu0 %vm986_vm1, %v2349_v32 }
 0x52a   : > { %v3180_v48 = vpop.f32.mrf.mxu1 }
 0x52b   : > { %v2350_v41 = vmax.f32 %v2300_v19, 0.0  ;;  %v3181_v1 = vadd.f32 %v3180_v48, %v3179_v18 }
 0x52c   : > { %v3182_v54 = vpop.f32.mrf.mxu1 }
 0x52d   : > { %v2305_v11 = vadd.f32 %v3181_v1, %v4540_v46  ;;  %3261 = vmatmul.mubr.msk.f32.gmra.mxu0 %vm986_vm1, %v2350_v41 }
 0x52e   : > { %v3183_v52 = vpop.f32.mrf.mxu1 }
 0x52f   : > { %v2351_v4 = vmax.f32 %v2305_v11, 0.0  ;;  %v3184_v20 = vadd.f32 %v3183_v52, %v3182_v54 }
 0x530   : > { %v3185_v16 = vpop.f32.mrf.mxu1 }
 0x531   : > { %v2310_v59 = vadd.f32 %v3184_v20, %v4540_v46  ;;  %3263 = vmatprep.mubr.msk.f32.mxu0 %vm986_vm1, %v2351_v4 }
 0x532   : > { %v3186_v49 = vpop.f32.mrf.mxu1 }
 0x533   : > { %v2352_v50 = vmax.f32 %v2310_v59, 0.0  ;;  %v3187_v0 = vadd.f32 %v3186_v49, %v3185_v16 }
 0x534   : > { %v3188_v62 = vpop.f32.mrf.mxu1 }
 0x535   : > { %v2315_v51 = vadd.f32 %v3187_v0, %v4540_v46  ;;  %3264 = vmatmul.mubr.msk.f32.gmra.mxu0 %vm986_vm1, %v2352_v50 }
 0x536   : > { %v3189_v9 = vpop.f32.mrf.mxu1 }
 0x537   : > { %v2353_v3 = vmax.f32 %v2315_v51, 0.0  ;;  %v3190_v21 = vadd.f32 %v3189_v9, %v3188_v62 }
 0x538   : > { %v3191_v53 = vpop.f32.mrf.mxu1 }
 0x539   : > { %v2320_v33 = vadd.f32 %v3190_v21, %v4540_v46  ;;  %3266 = vmatprep.mubr.msk.f32.mxu0 %vm986_vm1, %v2353_v3 }
 0x53a   : > { %v3192_v34 = vpop.f32.mrf.mxu1 }
 0x53b   : > { %v2354_v38 = vmax.f32 %v2320_v33, 0.0  ;;  %v3193_v44 = vadd.f32 %v3192_v34, %v3191_v53 }
 0x53c   : > { %v3194_v45 = vpop.f32.mrf.mxu1 }
 0x53d   : > { %v2325_v55 = vadd.f32 %v3193_v44, %v4540_v46  ;;  %3267 = vmatmul.mubr.msk.f32.gmra.mxu0 %vm986_vm1, %v2354_v38 }
 0x53e   : > { %v3195_v47 = vpop.f32.mrf.mxu1 }
 0x53f   : > { %v2355_v10 = vmax.f32 %v2325_v55, 0.0  ;;  %v3196_v57 = vadd.f32 %v3195_v47, %v3194_v45 }
 0x540   : > { %v3197_v12 = vpop.f32.mrf.mxu1 }
 0x541   : > { %v2330_v56 = vadd.f32 %v3196_v57, %v4540_v46  ;;  %3269 = vmatprep.mubr.msk.f32.mxu0 %vm986_vm1, %v2355_v10 }
 0x542   : > { %v3198_v13 = vpop.f32.mrf.mxu1 }
 0x543   : > { %v2356_v22 = vmax.f32 %v2330_v56, 0.0  ;;  %v3199_v2 = vadd.f32 %v3198_v13, %v3197_v12  ;;  %v3019_v56 = vld [vmem:[%s4695_s15] ss:$0 sm:$0xff] }
 0x544   : > { %v3200_v35 = vpop.f32.mrf.mxu1 }
 0x545   : > { %v2335_v36 = vadd.f32 %v3199_v2, %v4540_v46  ;;  %3270 = vmatmul.mubr.msk.f32.gmra.mxu0 %vm986_vm1, %v2356_v22 }
 0x546   : > { %v3201_v6 = vpop.f32.mrf.mxu1 }
 0x547   : > { %v2357_v23 = vmax.f32 %v2335_v36, 0.0  ;;  %v3202_v37 = vadd.f32 %v3201_v6, %v3200_v35 }
 0x549   : > { %v2340_v14 = vadd.f32 %v3202_v37, %v4540_v46  ;;  %3272 = vmatprep.mubr.msk.f32.mxu0 %vm986_vm1, %v2357_v23  ;;  %v2579_v46 = vld [vmem:[%s4694_s14 + $0x8] sm:$0xff] }
 0x54a   : > { %3285 = vmatprep.subr.mxu1 %v2579_v46 }
 0x54b   : > { %v2358_v24 = vmax.f32 %v2340_v14, 0.0  ;;  %3286 = vmatpush3.msra.mxu1 %v2579_v46 }
 0x54c   : > { %3287 = vmatprep.subr.mxu1 %v2578_v58 }
 0x54d   : > { %3273 = vmatmul.mubr.msk.f32.gmra.mxu0 %vm986_vm1, %v2358_v24  ;;  %3288 = vmatpush3.msra.mxu1 %v2578_v58 }
 0x5d5   : > { %v3253_v25 = vpop.f32.mrf.mxu0 }
 0x5d6   : > { %v2489_v40 = vadd.f32 %v3253_v25, %v3002_v8 }
 0x5d7   : > { %v2483_v42 = vpop.f32.mrf.mxu0 }
 0x5d8   : > { %v2484_v26 = vadd.f32 %v3002_v8, %v2483_v42  ;;  %v2563_v15 = vmax.f32 %v2489_v40, 0.0 }
 0x5da   : > { %v2562_v7 = vmax.f32 %v2484_v26, 0.0 }
 0x5dc   : > { %3289 = vmatprep.mubr.msk.f32.mxu1 %vm2592_vm4, %v2562_v7 }
 0x5dd   : > { %v3256_v43 = vpop.f32.mrf.mxu0  ;;  %3290 = vmatmul.mubr.msk.f32.vlgmr.msra.gmra.mxu1 %vm2592_vm4, %v2563_v15 }
 0x5de   : > { %v2499_v28 = vadd.f32 %v3256_v43, %v3002_v8 }
 0x5df   : > { %v2493_v27 = vpop.f32.mrf.mxu0 }
 0x5e0   : > { %v2494_v61 = vadd.f32 %v3002_v8, %v2493_v27  ;;  %v2565_v30 = vmax.f32 %v2499_v28, 0.0 }
 0x5e2   : > { %v2564_v60 = vmax.f32 %v2494_v61, 0.0 }
 0x5e4   : > { %3292 = vmatprep.mubr.msk.f32.mxu1 %vm2592_vm4, %v2564_v60 }
 0x5e5   : > { %v3259_v29 = vpop.f32.mrf.mxu0  ;;  %3293 = vmatmul.mubr.msk.f32.gmra.mxu1 %vm2592_vm4, %v2565_v30 }
 0x5e6   : > { %v2509_v17 = vadd.f32 %v3259_v29, %v3002_v8 }
 0x5e7   : > { %v2503_v63 = vpop.f32.mrf.mxu0 }
 0x5e8   : > { %v2504_v32 = vadd.f32 %v3002_v8, %v2503_v63  ;;  %v2567_v18 = vmax.f32 %v2509_v17, 0.0 }
 0x5ea   : > { %v2566_v31 = vmax.f32 %v2504_v32, 0.0 }
 0x5ec   : > { %3295 = vmatprep.mubr.msk.f32.mxu1 %vm2592_vm4, %v2566_v31 }
 0x5ed   : > { %v3262_v19 = vpop.f32.mrf.mxu0  ;;  %3296 = vmatmul.mubr.msk.f32.gmra.mxu1 %vm2592_vm4, %v2567_v18 }
 0x5ee   : > { %v2519_v48 = vadd.f32 %v3262_v19, %v3002_v8 }
 0x5ef   : > { %v2513_v41 = vpop.f32.mrf.mxu0 }
 0x5f0   : > { %v2514_v1 = vadd.f32 %v3002_v8, %v2513_v41  ;;  %v2569_v11 = vmax.f32 %v2519_v48, 0.0 }
 0x5f2   : > { %v2568_v54 = vmax.f32 %v2514_v1, 0.0 }
 0x5f4   : > { %3298 = vmatprep.mubr.msk.f32.mxu1 %vm2592_vm4, %v2568_v54 }
 0x5f5   : > { %v3265_v52 = vpop.f32.mrf.mxu0  ;;  %3299 = vmatmul.mubr.msk.f32.gmra.mxu1 %vm2592_vm4, %v2569_v11 }
 0x5f6   : > { %v2529_v4 = vadd.f32 %v3265_v52, %v3002_v8 }
 0x5f7   : > { %v2523_v20 = vpop.f32.mrf.mxu0 }
 0x5f8   : > { %v2524_v16 = vadd.f32 %v3002_v8, %v2523_v20  ;;  %v2571_v49 = vmax.f32 %v2529_v4, 0.0 }
 0x5fa   : > { %v2570_v59 = vmax.f32 %v2524_v16, 0.0 }
 0x5fc   : > { %3301 = vmatprep.mubr.msk.f32.mxu1 %vm2592_vm4, %v2570_v59 }
 0x5fd   : > { %v3268_v50 = vpop.f32.mrf.mxu0  ;;  %3302 = vmatmul.mubr.msk.f32.gmra.mxu1 %vm2592_vm4, %v2571_v49 }
 0x5fe   : > { %v2539_v0 = vadd.f32 %v3268_v50, %v3002_v8 }
 0x5ff   : > { %v2533_v62 = vpop.f32.mrf.mxu0 }
 0x600   : > { %v2534_v51 = vadd.f32 %v3002_v8, %v2533_v62  ;;  %v2573_v3 = vmax.f32 %v2539_v0, 0.0 }
 0x602   : > { %v2572_v9 = vmax.f32 %v2534_v51, 0.0 }
 0x604   : > { %3304 = vmatprep.mubr.msk.f32.mxu1 %vm2592_vm4, %v2572_v9 }
 0x605   : > { %v3271_v21 = vpop.f32.mrf.mxu0  ;;  %3305 = vmatmul.mubr.msk.f32.gmra.mxu1 %vm2592_vm4, %v2573_v3 }
 0x606   : > { %v2549_v53 = vadd.f32 %v3271_v21, %v3002_v8 }
 0x607   : > { %v2543_v33 = vpop.f32.mrf.mxu0 }
 0x608   : > { %v2544_v34 = vadd.f32 %v3002_v8, %v2543_v33  ;;  %v2575_v44 = vmax.f32 %v2549_v53, 0.0 }
 0x60a   : > { %v2574_v38 = vmax.f32 %v2544_v34, 0.0 }
 0x60c   : > { %3307 = vmatprep.mubr.msk.f32.mxu1 %vm2592_vm4, %v2574_v38 }
 0x60d   : > { %v3274_v45 = vpop.f32.mrf.mxu0  ;;  %3308 = vmatmul.mubr.msk.f32.gmra.mxu1 %vm2592_vm4, %v2575_v44 }
 0x60e   : > { %v2559_v55 = vadd.f32 %v3274_v45, %v3002_v8 }
 0x60f   : > { %v2553_v47 = vpop.f32.mrf.mxu0 }
 0x610   : > { %v2554_v10 = vadd.f32 %v3002_v8, %v2553_v47  ;;  %v2577_v12 = vmax.f32 %v2559_v55, 0.0 }
 0x612   : > { %v2576_v57 = vmax.f32 %v2554_v10, 0.0 }
 0x614   : > { %3310 = vmatprep.mubr.msk.f32.mxu1 %vm2592_vm4, %v2576_v57 }
 0x615   : > { %3311 = vmatmul.mubr.msk.f32.gmra.mxu1 %vm2592_vm4, %v2577_v12 }
 0x69d   : > { %v3291_v13 = vpop.f32.mrf.mxu1 }
 0x69e   : > { %v2717_v22 = vadd.f32 %v3291_v13, %v3019_v56 }
 0x69f   : > { %v2711_v2 = vpop.f32.mrf.mxu1 }
 0x6a0   : > { %2791 = vst [vmem:[%s4611_s26 + $0x8] sm:$0xff] %v2717_v22  ;;  %v2712_v35 = vadd.f32 %v3019_v56, %v2711_v2 }
 0x6a2   : > { %2790 = vst [vmem:[%s4611_s26] sm:$0xff] %v2712_v35 }
 0x6a5   : > { %v3294_v36 = vpop.f32.mrf.mxu1 }
 0x6a6   : > { %v2727_v6 = vadd.f32 %v3294_v36, %v3019_v56 }
 0x6a7   : > { %v2721_v23 = vpop.f32.mrf.mxu1 }
 0x6a8   : > { %2793 = vst [vmem:[%s4611_s26 + $0x18] sm:$0xff] %v2727_v6  ;;  %v2722_v37 = vadd.f32 %v3019_v56, %v2721_v23 }
 0x6aa   : > { %2792 = vst [vmem:[%s4611_s26 + $0x10] sm:$0xff] %v2722_v37 }
 0x6ad   : > { %v3297_v14 = vpop.f32.mrf.mxu1 }
 0x6ae   : > { %v2737_v24 = vadd.f32 %v3297_v14, %v3019_v56 }
 0x6af   : > { %v2731_v5 = vpop.f32.mrf.mxu1 }
 0x6b0   : > { %2795 = vst [vmem:[%s4611_s26 + $0x28] sm:$0xff] %v2737_v24  ;;  %v2732_v39 = vadd.f32 %v3019_v56, %v2731_v5 }
 0x6b2   : > { %2794 = vst [vmem:[%s4611_s26 + $0x20] sm:$0xff] %v2732_v39 }
 0x6b5   : > { %v3300_v46 = vpop.f32.mrf.mxu1 }
 0x6b6   : > { %v2747_v58 = vadd.f32 %v3300_v46, %v3019_v56 }
 0x6b7   : > { %v2741_v8 = vpop.f32.mrf.mxu1 }
 0x6b8   : > { %2797 = vst [vmem:[%s4611_s26 + $0x38] sm:$0xff] %v2747_v58  ;;  %v2742_v25 = vadd.f32 %v3019_v56, %v2741_v8 }
 0x6ba   : > { %2796 = vst [vmem:[%s4611_s26 + $0x30] sm:$0xff] %v2742_v25 }
 0x6bd   : > { %v3303_v40 = vpop.f32.mrf.mxu1 }
 0x6be   : > { %v2757_v42 = vadd.f32 %v3303_v40, %v3019_v56 }
 0x6bf   : > { %v2751_v26 = vpop.f32.mrf.mxu1 }
 0x6c0   : > { %2799 = vst [vmem:[%s4611_s26 + $0x48] sm:$0xff] %v2757_v42  ;;  %v2752_v7 = vadd.f32 %v3019_v56, %v2751_v26 }
 0x6c2   : > { %2798 = vst [vmem:[%s4611_s26 + $0x40] sm:$0xff] %v2752_v7 }
 0x6c5   : > { %v3306_v15 = vpop.f32.mrf.mxu1 }
 0x6c6   : > { %v2767_v43 = vadd.f32 %v3306_v15, %v3019_v56 }
 0x6c7   : > { %v2761_v28 = vpop.f32.mrf.mxu1 }
 0x6c8   : > { %2801 = vst [vmem:[%s4611_s26 + $0x58] sm:$0xff] %v2767_v43  ;;  %v2762_v27 = vadd.f32 %v3019_v56, %v2761_v28 }
 0x6ca   : > { %2800 = vst [vmem:[%s4611_s26 + $0x50] sm:$0xff] %v2762_v27 }
 0x6cd   : > { %v3309_v61 = vpop.f32.mrf.mxu1 }
 0x6ce   : > { %v2777_v60 = vadd.f32 %v3309_v61, %v3019_v56 }
 0x6cf   : > { %v2771_v30 = vpop.f32.mrf.mxu1 }
 0x6d0   : > { %2803 = vst [vmem:[%s4611_s26 + $0x68] sm:$0xff] %v2777_v60  ;;  %v2772_v29 = vadd.f32 %v3019_v56, %v2771_v30 }
 0x6d2   : > { %2802 = vst [vmem:[%s4611_s26 + $0x60] sm:$0xff] %v2772_v29 }
 0x6d5   : > { %v3312_v17 = vpop.f32.mrf.mxu1 }
 0x6d6   : > { %v2787_v63 = vadd.f32 %v3312_v17, %v3019_v56 }
 0x6d7   : > { %v2781_v32 = vpop.f32.mrf.mxu1 }
 0x6d8   : > { %2805 = vst [vmem:[%s4611_s26 + $0x78] sm:$0xff] %v2787_v63  ;;  %v2782_v31 = vadd.f32 %v3019_v56, %v2781_v32 }
 0x6da   : > { %2804 = vst [vmem:[%s4611_s26 + $0x70] sm:$0xff] %v2782_v31 }
 0x6db   : > { %3368 = shalt.err (!%p3365_p3)
}
 0x6dc   : > { %s3369_s23 = scalar_lea.hbm %s4632_s27, 2048  ;;  %s3373_s29 = scalar_lea.hbm %s4696_s16, 4096 }
 0x6dd   : > { %p3370_p4 = scmp.ne.s32.totalorder %s4632_s27, %s3369_s23  ;;  %p3374_p9 = scmp.lt.s32.totalorder %s4632_s27, %s4696_s16 }
 0x6de   : > { %p3375_p10 = scmp.lt.s32.totalorder %s3373_s29, %s3369_s23 }
 0x6df   : > { %p3371_p7 = pnand %p3370_p4, %p3544_p5 }
 0x6e0   : > { %p3376_p11 = por %p3375_p10, %p3374_p9 }
 0x6e1   : > { %p3372_p8 = pneg %p3371_p7 }
 0x6e3   : > { %p3377_p12 = pnand %p3376_p11, %p3372_p8 }
 0x6e5   : > { %3380 = shalt.err (!%p3377_p12)
}
 0x6e6   : > { %s3419_s25 = smov 128   ;;  %s3420_s19 = smov 8  }
 0x6e7   : > { %3313 = dma.vmem_to_hbm [thread:$0]  (%p3544_p5), %s4634_s21, 2048, %s4632_s27, %s4640_s30, %s3419_s25, %s3419_s25, %s3420_s19  }
 0x6e8 PF: > { %s4711_s20 = sld [smem:[#allocation5_spill]]  ;;  %p3319_p13 = scmp.ge.s32.totalorder %s3415_s24, 2 }
 0x6ea   : > { %p3316_p0 = pnand %p3319_p13, %p3548_p6 }
 0x6ec   : > { %p3317_p1 = pneg %p3316_p0 }
 0x6ee   : > { %s2835_s28 = sand.u32 1, %s4711_s20  }
 0x6ef   : > { %s2836_s23 = scalar_lea.sflag [#allocation3], %s2835_s28 }
 0x6f0   : > { %3398 = dma.done.wait (%p3317_p1), %s2836_s23, 2048  }
 0x6f1   : > { %3400 = vsyncadd (%p3317_p1), %s2836_s23, 4294965248  ;;  %s4713_s24 = sld [smem:[#allocation7_spill]]  ;;  %s4716_s21 = smov %s3407_s22 }
 0x6f2   : > { %s4714_s29 = sld [smem:[#allocation6_spill]] }
 0x6f3   : > { %s4715_s23 = sld [smem:[#allocation8_spill]] }
 0x6f7   : > { %p26_p2 = scmp.ge.s32.totalorder %s4713_s24, 4  }
 0x6f8   : > { %s4717_s22 = smov %s4714_s29 }
 0x6f9   :  { %28 = sbr.rel (!%p26_p2) target bundleno = 5 (0x5), region = 122 }
 0x6fe   :  { %2841 = vsyncpa [#allocation3], 1 }
 0x6ff   :  { %2843 = vsyncpa [#allocation3 + $0x1], 1 }

</bundles_post_ra>
